<compile_context>
chip_gen: v5e
topology: v5e:2x2
jax: 0.10.0
libtpu: 0.0.40
codegen_flags: <defaults>
</compile_context>

<pallas_src>
import jax
import jax.numpy as jnp
from jax.experimental import pallas as pl
from jax.experimental.pallas import tpu as pltpu


KS = (39, 19, 9)      # kernel sizes produced by ks=40: [40, 20, 10] -> odd-ified [39, 19, 9]
PAD = KS[0] // 2      # 19 = maximum conv padding


def inception_kernel(x_ref, wb_ref, wc0_ref, wc1_ref, wc2_ref, wmp_ref,
                     scale_ref, shift_ref, out_ref, ypad_ref, xpad_ref):
    B, ni, L = x_ref.shape
    nf = wb_ref.shape[0]

    # ---- initialize padded scratch buffers --------------------------------
    ypad_ref[...] = jnp.zeros(ypad_ref.shape, jnp.float32)                       # zero pad (convs)
    xpad_ref[...] = jnp.full(xpad_ref.shape, jnp.finfo(jnp.float32).min,
                             jnp.float32)                                        # -inf pad (maxpool)

    wb = wb_ref[...]        # (nf, ni)
    wmp = wmp_ref[...]      # (nf, ni)
    scale = scale_ref[...]  # (4*nf, 1)  folded BN scale
    shift = shift_ref[...]  # (4*nf, 1)  folded BN shift
    conv_ws = (wc0_ref[...], wc1_ref[...], wc2_ref[...])   # (nf, k*nf) each, pre-flattened

    # ---- bottleneck (1x1 conv) written into the zero-padded scratch -------
    for b in range(B):
        y_b = jnp.dot(wb, x_ref[b], preferred_element_type=jnp.float32)  # (nf, L)
        ypad_ref[b, :, PAD:PAD + L] = y_b

    # ---- MaxPool1d(3, stride=1, padding=1) on the original input ----------
    xpad_ref[:, :, 1:1 + L] = x_ref[...]
    xpad = xpad_ref[...]
    mp = jnp.maximum(jnp.maximum(xpad[:, :, 0:L], xpad[:, :, 1:1 + L]),
                     xpad[:, :, 2:2 + L])                                 # (B, ni, L)

    # ---- per batch: 3 conv branches (one matmul each) + maxconv + BN + ReLU
    for b in range(B):
        ypad_b = ypad_ref[b]                                              # (nf, L + 2*PAD)
        branches = []
        for w_cat, k in zip(conv_ws, KS):
            base = PAD - k // 2
            # Stack the k shifted windows along channels -> one big contraction on the MXU.
            x_cat = jnp.concatenate(
                [ypad_b[:, base + j: base + j + L] for j in range(k)], axis=0)   # (k*nf, L)
            branches.append(jnp.dot(w_cat, x_cat,
                                    preferred_element_type=jnp.float32))         # (nf, L)
        branches.append(jnp.dot(wmp, mp[b], preferred_element_type=jnp.float32))  # maxconvpool
        cat = jnp.concatenate(branches, axis=0)                                   # (4*nf, L)
        # Folded eval-mode BatchNorm + ReLU, single lane-dense store per batch element.
        out_ref[b] = jnp.maximum(cat * scale + shift, 0.0).astype(out_ref.dtype)


def inception_forward(x, params, eps=1e-5):
    """x: (B, ni, L) float32 (PyTorch Conv1d layout). Returns (B, 4*nf, L) float32."""
    B, ni, L = x.shape
    nf = params["w_bottleneck"].shape[0]

    # Fold eval-mode BatchNorm into per-channel scale/shift.
    # TODO(synk): training-mode BatchNorm (batch statistics) not implemented; eval semantics only.
    scale = params["bn_gamma"] / jnp.sqrt(params["bn_var"] + eps)
    shift = params["bn_beta"] - params["bn_mean"] * scale
    scale = scale.reshape(4 * nf, 1).astype(jnp.float32)
    shift = shift.reshape(4 * nf, 1).astype(jnp.float32)

    # Pre-flatten conv weights (layout plumbing only): (out, in, k) -> (out, k*in),
    # row ordering matches the kernel's concatenated-window operand (row = j*in + c).
    def flatten_w(w):
        o, i, k = w.shape
        return jnp.transpose(w, (0, 2, 1)).reshape(o, k * i)

    wcs = [flatten_w(params[f"w_conv{i}"]) for i in range(3)]
    wb = params["w_bottleneck"][:, :, 0]    # (nf, ni)   1x1 conv
    wmp = params["w_maxconv"][:, :, 0]      # (nf, ni)   1x1 conv after maxpool
    # TODO(synk): Identity bottleneck path (bottleneck=False or ni==1) not implemented.

    def full(shape):
        return pl.BlockSpec(shape, lambda i, _n=len(shape): (0,) * _n)

    grid_spec = pltpu.PrefetchScalarGridSpec(
        num_scalar_prefetch=0,
        grid=(1,),   # single invocation: whole problem fits comfortably in VMEM
        in_specs=[
            full((B, ni, L)),                                     # x
            full(wb.shape),                                       # bottleneck weight
            full(wcs[0].shape), full(wcs[1].shape), full(wcs[2].shape),  # conv weights (flat)
            full(wmp.shape),                                      # maxconvpool conv weight
            full((4 * nf, 1)), full((4 * nf, 1)),                 # BN scale / shift
        ],
        out_specs=full((B, 4 * nf, L)),
        scratch_shapes=[
            pltpu.VMEM((B, nf, L + 2 * PAD), jnp.float32),  # zero-padded bottleneck output
            pltpu.VMEM((B, ni, L + 2), jnp.float32),        # -inf-padded maxpool input
        ],
    )

    return pl.pallas_call(
        inception_kernel,
        out_shape=jax.ShapeDtypeStruct((B, 4 * nf, L), jnp.float32),
        grid_spec=grid_spec,
        compiler_params=pltpu.CompilerParams(dimension_semantics=("arbitrary",)),
    )(x, wb, wcs[0], wcs[1], wcs[2], wmp, scale, shift)


def inception_ref(x, params, eps=1e-5):
    """Pure-JAX reference matching PyTorch InceptionModule (eval-mode BN)."""
    def conv1d(inp, w, pad):
        return jax.lax.conv_general_dilated(
            inp, w, window_strides=(1,), padding=[(pad, pad)],
            dimension_numbers=("NCH", "OIH", "NCH"))

    y = conv1d(x, params["w_bottleneck"], 0)
    branches = [conv1d(y, params[f"w_conv{i}"], KS[i] // 2) for i in range(3)]
    mp = jax.lax.reduce_window(x, jnp.array(-jnp.inf, jnp.float32), jax.lax.max,
                               window_dimensions=(1, 1, 3),
                               window_strides=(1, 1, 1),
                               padding=((0, 0), (0, 0), (1, 1)))
    branches.append(conv1d(mp, params["w_maxconv"], 0))
    cat = jnp.concatenate(branches, axis=1)
    g = params["bn_gamma"][None, :, None]
    b = params["bn_beta"][None, :, None]
    m = params["bn_mean"][None, :, None]
    v = params["bn_var"][None, :, None]
    return jnp.maximum((cat - m) / jnp.sqrt(v + eps) * g + b, 0.0)


def init_params(key, ni, nf):
    ks = jax.random.split(key, 9)

    def u(k, shape, fan_in):
        bound = 1.0 / jnp.sqrt(jnp.float32(fan_in))
        return jax.random.uniform(k, shape, jnp.float32, -bound, bound)

    return {
        "w_bottleneck": u(ks[0], (nf, ni, 1), ni),
        "w_conv0": u(ks[1], (nf, nf, KS[0]), nf * KS[0]),
        "w_conv1": u(ks[2], (nf, nf, KS[1]), nf * KS[1]),
        "w_conv2": u(ks[3], (nf, nf, KS[2]), nf * KS[2]),
        "w_maxconv": u(ks[4], (nf, ni, 1), ni),
        "bn_gamma": jax.random.uniform(ks[5], (4 * nf,), jnp.float32, 0.5, 1.5),
        "bn_beta": jax.random.uniform(ks[6], (4 * nf,), jnp.float32, -0.5, 0.5),
        "bn_mean": jax.random.uniform(ks[7], (4 * nf,), jnp.float32, -0.5, 0.5),
        "bn_var": jax.random.uniform(ks[8], (4 * nf,), jnp.float32, 0.5, 1.5),
    }


if __name__ == "__main__":
    B, NI, NF, L = 2, 4, 8, 128   # batch=2, in-channels=4, filters=8, length=128 (lane-dense)
    key = jax.random.PRNGKey(0)
    kx, kp = jax.random.split(key)
    x = jax.random.normal(kx, (B, NI, L), jnp.float32)
    params = init_params(kp, NI, NF)

    out = jax.block_until_ready(inception_forward(x, params))
    ref = jax.block_until_ready(inception_ref(x, params))

    assert out.shape == (B, 4 * NF, L), out.shape
    max_err = float(jnp.max(jnp.abs(out - ref)))
    assert jnp.allclose(out, ref, atol=1e-4, rtol=1e-4), max_err
    print("KERNEL_OK")
</pallas_src>

<mosaic_0001>
module attributes {stable_mosaic.version = 11 : i64} {
  func.func @inception_kernel(%arg0: i32, %arg1: memref<2x4x128xf32, #tpu.memory_space<vmem>>, %arg2: memref<8x4xf32, #tpu.memory_space<vmem>>, %arg3: memref<8x312xf32, #tpu.memory_space<vmem>>, %arg4: memref<8x152xf32, #tpu.memory_space<vmem>>, %arg5: memref<8x72xf32, #tpu.memory_space<vmem>>, %arg6: memref<8x4xf32, #tpu.memory_space<vmem>>, %arg7: memref<32x1xf32, #tpu.memory_space<vmem>>, %arg8: memref<32x1xf32, #tpu.memory_space<vmem>>, %arg9: memref<2x32x128xf32, #tpu.memory_space<vmem>>, %arg10: memref<2x8x166xf32, #tpu.memory_space<vmem>>, %arg11: memref<2x4x130xf32, #tpu.memory_space<vmem>>) attributes {dimension_semantics = [#tpu.dimension_semantics<arbitrary>], iteration_bounds = array<i64: 1>, scalar_prefetch = 0 : i64, scratch_operands = 2 : i64, tpu.core_type = #tpu.core_type<tc>, window_params = [{pipeline_mode = #tpu.pipeline_mode<synchronous>, transform_indices = @transform_0, window_bounds = array<i64: 2, 4, 128>}, {pipeline_mode = #tpu.pipeline_mode<synchronous>, transform_indices = @transform_1, window_bounds = array<i64: 8, 4>}, {pipeline_mode = #tpu.pipeline_mode<synchronous>, transform_indices = @transform_2, window_bounds = array<i64: 8, 312>}, {pipeline_mode = #tpu.pipeline_mode<synchronous>, transform_indices = @transform_3, window_bounds = array<i64: 8, 152>}, {pipeline_mode = #tpu.pipeline_mode<synchronous>, transform_indices = @transform_4, window_bounds = array<i64: 8, 72>}, {pipeline_mode = #tpu.pipeline_mode<synchronous>, transform_indices = @transform_5, window_bounds = array<i64: 8, 4>}, {pipeline_mode = #tpu.pipeline_mode<synchronous>, transform_indices = @transform_6, window_bounds = array<i64: 32, 1>}, {pipeline_mode = #tpu.pipeline_mode<synchronous>, transform_indices = @transform_7, window_bounds = array<i64: 32, 1>}, {pipeline_mode = #tpu.pipeline_mode<synchronous>, transform_indices = @transform_8, window_bounds = array<i64: 2, 32, 128>}]} {
    %cst = arith.constant 0.000000e+00 : f32
    %0 = vector.broadcast %cst : f32 to vector<2x8x166xf32>
    %c0 = arith.constant 0 : index
    %c0_0 = arith.constant 0 : index
    %c0_1 = arith.constant 0 : index
    %1 = vector.load %arg10[%c0, %c0_0, %c0_1] : memref<2x8x166xf32, #tpu.memory_space<vmem>>, vector<2x8x166xf32>
    tpu.vector_store %arg10[%c0, %c0_0, %c0_1], %0 {strides = array<i32>} : memref<2x8x166xf32, #tpu.memory_space<vmem>>, vector<2x8x166xf32>,
    %cst_2 = arith.constant -3.40282347E+38 : f32
    %2 = vector.broadcast %cst_2 : f32 to vector<2x4x130xf32>
    %c0_3 = arith.constant 0 : index
    %c0_4 = arith.constant 0 : index
    %c0_5 = arith.constant 0 : index
    %3 = vector.load %arg11[%c0_3, %c0_4, %c0_5] : memref<2x4x130xf32, #tpu.memory_space<vmem>>, vector<2x4x130xf32>
    tpu.vector_store %arg11[%c0_3, %c0_4, %c0_5], %2 {strides = array<i32>} : memref<2x4x130xf32, #tpu.memory_space<vmem>>, vector<2x4x130xf32>,
    %c0_6 = arith.constant 0 : index
    %c0_7 = arith.constant 0 : index
    %4 = vector.load %arg2[%c0_6, %c0_7] : memref<8x4xf32, #tpu.memory_space<vmem>>, vector<8x4xf32>
    %c0_8 = arith.constant 0 : index
    %c0_9 = arith.constant 0 : index
    %5 = vector.load %arg6[%c0_8, %c0_9] : memref<8x4xf32, #tpu.memory_space<vmem>>, vector<8x4xf32>
    %c0_10 = arith.constant 0 : index
    %c0_11 = arith.constant 0 : index
    %6 = vector.load %arg7[%c0_10, %c0_11] : memref<32x1xf32, #tpu.memory_space<vmem>>, vector<32x1xf32>
    %c0_12 = arith.constant 0 : index
    %c0_13 = arith.constant 0 : index
    %7 = vector.load %arg8[%c0_12, %c0_13] : memref<32x1xf32, #tpu.memory_space<vmem>>, vector<32x1xf32>
    %c0_14 = arith.constant 0 : index
    %c0_15 = arith.constant 0 : index
    %8 = vector.load %arg3[%c0_14, %c0_15] : memref<8x312xf32, #tpu.memory_space<vmem>>, vector<8x312xf32>
    %c0_16 = arith.constant 0 : index
    %c0_17 = arith.constant 0 : index
    %9 = vector.load %arg4[%c0_16, %c0_17] : memref<8x152xf32, #tpu.memory_space<vmem>>, vector<8x152xf32>
    %c0_18 = arith.constant 0 : index
    %c0_19 = arith.constant 0 : index
    %10 = vector.load %arg5[%c0_18, %c0_19] : memref<8x72xf32, #tpu.memory_space<vmem>>, vector<8x72xf32>
    %c0_20 = arith.constant 0 : index
    %c0_21 = arith.constant 0 : index
    %c0_22 = arith.constant 0 : index
    %11 = vector.load %arg1[%c0_20, %c0_21, %c0_22] : memref<2x4x128xf32, #tpu.memory_space<vmem>>, vector<1x4x128xf32>
    %12 = vector.shape_cast %11 : vector<1x4x128xf32> to vector<4x128xf32>
    %cst_23 = arith.constant dense<0.000000e+00> : vector<8x128xf32>
    %13 = tpu.matmul %4, %12, %cst_23 {dimension_numbers = #tpu.dot_dimension_numbers<[1], [0], [0], [1], [0, 0, 1, 1], [], []>} : vector<8x4xf32>, vector<4x128xf32>, vector<8x128xf32> -> vector<8x128xf32>
    %c0_24 = arith.constant 0 : index
    %c0_25 = arith.constant 0 : index
    %c19 = arith.constant 19 : index
    %14 = vector.load %arg10[%c0_24, %c0_25, %c19] : memref<2x8x166xf32, #tpu.memory_space<vmem>>, vector<1x8x128xf32>
    %15 = vector.shape_cast %14 : vector<1x8x128xf32> to vector<8x128xf32>
    %16 = vector.shape_cast %13 : vector<8x128xf32> to vector<1x8x128xf32>
    tpu.vector_store %arg10[%c0_24, %c0_25, %c19], %16 {strides = array<i32>} : memref<2x8x166xf32, #tpu.memory_space<vmem>>, vector<1x8x128xf32>,
    %c1 = arith.constant 1 : index
    %c0_26 = arith.constant 0 : index
    %c0_27 = arith.constant 0 : index
    %17 = vector.load %arg1[%c1, %c0_26, %c0_27] : memref<2x4x128xf32, #tpu.memory_space<vmem>>, vector<1x4x128xf32>
    %18 = vector.shape_cast %17 : vector<1x4x128xf32> to vector<4x128xf32>
    %cst_28 = arith.constant dense<0.000000e+00> : vector<8x128xf32>
    %19 = tpu.matmul %4, %18, %cst_28 {dimension_numbers = #tpu.dot_dimension_numbers<[1], [0], [0], [1], [0, 0, 1, 1], [], []>} : vector<8x4xf32>, vector<4x128xf32>, vector<8x128xf32> -> vector<8x128xf32>
    %c1_29 = arith.constant 1 : index
    %c0_30 = arith.constant 0 : index
    %c19_31 = arith.constant 19 : index
    %20 = vector.load %arg10[%c1_29, %c0_30, %c19_31] : memref<2x8x166xf32, #tpu.memory_space<vmem>>, vector<1x8x128xf32>
    %21 = vector.shape_cast %20 : vector<1x8x128xf32> to vector<8x128xf32>
    %22 = vector.shape_cast %19 : vector<8x128xf32> to vector<1x8x128xf32>
    tpu.vector_store %arg10[%c1_29, %c0_30, %c19_31], %22 {strides = array<i32>} : memref<2x8x166xf32, #tpu.memory_space<vmem>>, vector<1x8x128xf32>,
    %c0_32 = arith.constant 0 : index
    %c0_33 = arith.constant 0 : index
    %c0_34 = arith.constant 0 : index
    %23 = vector.load %arg1[%c0_32, %c0_33, %c0_34] : memref<2x4x128xf32, #tpu.memory_space<vmem>>, vector<2x4x128xf32>
    %c0_35 = arith.constant 0 : index
    %c0_36 = arith.constant 0 : index
    %c1_37 = arith.constant 1 : index
    %24 = vector.load %arg11[%c0_35, %c0_36, %c1_37] : memref<2x4x130xf32, #tpu.memory_space<vmem>>, vector<2x4x128xf32>
    tpu.vector_store %arg11[%c0_35, %c0_36, %c1_37], %23 {strides = array<i32>} : memref<2x4x130xf32, #tpu.memory_space<vmem>>, vector<2x4x128xf32>,
    %c0_38 = arith.constant 0 : index
    %c0_39 = arith.constant 0 : index
    %c0_40 = arith.constant 0 : index
    %25 = vector.load %arg11[%c0_38, %c0_39, %c0_40] : memref<2x4x130xf32, #tpu.memory_space<vmem>>, vector<2x4x130xf32>
    %26 = vector.extract_strided_slice %25 {offsets = [0, 0, 0], sizes = [2, 4, 128], strides = [1, 1, 1]} : vector<2x4x130xf32> to vector<2x4x128xf32>
    %27 = vector.extract_strided_slice %25 {offsets = [0, 0, 1], sizes = [2, 4, 128], strides = [1, 1, 1]} : vector<2x4x130xf32> to vector<2x4x128xf32>
    %28 = arith.maximumf %26, %27 : vector<2x4x128xf32>
    %29 = vector.extract_strided_slice %25 {offsets = [0, 0, 2], sizes = [2, 4, 128], strides = [1, 1, 1]} : vector<2x4x130xf32> to vector<2x4x128xf32>
    %30 = arith.maximumf %28, %29 : vector<2x4x128xf32>
    %c0_41 = arith.constant 0 : index
    %c0_42 = arith.constant 0 : index
    %c0_43 = arith.constant 0 : index
    %31 = vector.load %arg10[%c0_41, %c0_42, %c0_43] : memref<2x8x166xf32, #tpu.memory_space<vmem>>, vector<1x8x166xf32>
    %32 = vector.shape_cast %31 : vector<1x8x166xf32> to vector<8x166xf32>
    %33 = vector.extract_strided_slice %32 {offsets = [0, 0], sizes = [8, 128], strides = [1, 1]} : vector<8x166xf32> to vector<8x128xf32>
    %34 = vector.extract_strided_slice %32 {offsets = [0, 1], sizes = [8, 128], strides = [1, 1]} : vector<8x166xf32> to vector<8x128xf32>
    %35 = vector.extract_strided_slice %32 {offsets = [0, 2], sizes = [8, 128], strides = [1, 1]} : vector<8x166xf32> to vector<8x128xf32>
    %36 = vector.extract_strided_slice %32 {offsets = [0, 3], sizes = [8, 128], strides = [1, 1]} : vector<8x166xf32> to vector<8x128xf32>
    %37 = vector.extract_strided_slice %32 {offsets = [0, 4], sizes = [8, 128], strides = [1, 1]} : vector<8x166xf32> to vector<8x128xf32>
    %38 = vector.extract_strided_slice %32 {offsets = [0, 5], sizes = [8, 128], strides = [1, 1]} : vector<8x166xf32> to vector<8x128xf32>
    %39 = vector.extract_strided_slice %32 {offsets = [0, 6], sizes = [8, 128], strides = [1, 1]} : vector<8x166xf32> to vector<8x128xf32>
    %40 = vector.extract_strided_slice %32 {offsets = [0, 7], sizes = [8, 128], strides = [1, 1]} : vector<8x166xf32> to vector<8x128xf32>
    %41 = vector.extract_strided_slice %32 {offsets = [0, 8], sizes = [8, 128], strides = [1, 1]} : vector<8x166xf32> to vector<8x128xf32>
    %42 = vector.extract_strided_slice %32 {offsets = [0, 9], sizes = [8, 128], strides = [1, 1]} : vector<8x166xf32> to vector<8x128xf32>
    %43 = vector.extract_strided_slice %32 {offsets = [0, 10], sizes = [8, 128], strides = [1, 1]} : vector<8x166xf32> to vector<8x128xf32>
    %44 = vector.extract_strided_slice %32 {offsets = [0, 11], sizes = [8, 128], strides = [1, 1]} : vector<8x166xf32> to vector<8x128xf32>
    %45 = vector.extract_strided_slice %32 {offsets = [0, 12], sizes = [8, 128], strides = [1, 1]} : vector<8x166xf32> to vector<8x128xf32>
    %46 = vector.extract_strided_slice %32 {offsets = [0, 13], sizes = [8, 128], strides = [1, 1]} : vector<8x166xf32> to vector<8x128xf32>
    %47 = vector.extract_strided_slice %32 {offsets = [0, 14], sizes = [8, 128], strides = [1, 1]} : vector<8x166xf32> to vector<8x128xf32>
    %48 = vector.extract_strided_slice %32 {offsets = [0, 15], sizes = [8, 128], strides = [1, 1]} : vector<8x166xf32> to vector<8x128xf32>
    %49 = vector.extract_strided_slice %32 {offsets = [0, 16], sizes = [8, 128], strides = [1, 1]} : vector<8x166xf32> to vector<8x128xf32>
    %50 = vector.extract_strided_slice %32 {offsets = [0, 17], sizes = [8, 128], strides = [1, 1]} : vector<8x166xf32> to vector<8x128xf32>
    %51 = vector.extract_strided_slice %32 {offsets = [0, 18], sizes = [8, 128], strides = [1, 1]} : vector<8x166xf32> to vector<8x128xf32>
    %52 = vector.extract_strided_slice %32 {offsets = [0, 19], sizes = [8, 128], strides = [1, 1]} : vector<8x166xf32> to vector<8x128xf32>
    %53 = vector.extract_strided_slice %32 {offsets = [0, 20], sizes = [8, 128], strides = [1, 1]} : vector<8x166xf32> to vector<8x128xf32>
    %54 = vector.extract_strided_slice %32 {offsets = [0, 21], sizes = [8, 128], strides = [1, 1]} : vector<8x166xf32> to vector<8x128xf32>
    %55 = vector.extract_strided_slice %32 {offsets = [0, 22], sizes = [8, 128], strides = [1, 1]} : vector<8x166xf32> to vector<8x128xf32>
    %56 = vector.extract_strided_slice %32 {offsets = [0, 23], sizes = [8, 128], strides = [1, 1]} : vector<8x166xf32> to vector<8x128xf32>
    %57 = vector.extract_strided_slice %32 {offsets = [0, 24], sizes = [8, 128], strides = [1, 1]} : vector<8x166xf32> to vector<8x128xf32>
    %58 = vector.extract_strided_slice %32 {offsets = [0, 25], sizes = [8, 128], strides = [1, 1]} : vector<8x166xf32> to vector<8x128xf32>
    %59 = vector.extract_strided_slice %32 {offsets = [0, 26], sizes = [8, 128], strides = [1, 1]} : vector<8x166xf32> to vector<8x128xf32>
    %60 = vector.extract_strided_slice %32 {offsets = [0, 27], sizes = [8, 128], strides = [1, 1]} : vector<8x166xf32> to vector<8x128xf32>
    %61 = vector.extract_strided_slice %32 {offsets = [0, 28], sizes = [8, 128], strides = [1, 1]} : vector<8x166xf32> to vector<8x128xf32>
    %62 = vector.extract_strided_slice %32 {offsets = [0, 29], sizes = [8, 128], strides = [1, 1]} : vector<8x166xf32> to vector<8x128xf32>
    %63 = vector.extract_strided_slice %32 {offsets = [0, 30], sizes = [8, 128], strides = [1, 1]} : vector<8x166xf32> to vector<8x128xf32>
    %64 = vector.extract_strided_slice %32 {offsets = [0, 31], sizes = [8, 128], strides = [1, 1]} : vector<8x166xf32> to vector<8x128xf32>
    %65 = vector.extract_strided_slice %32 {offsets = [0, 32], sizes = [8, 128], strides = [1, 1]} : vector<8x166xf32> to vector<8x128xf32>
    %66 = vector.extract_strided_slice %32 {offsets = [0, 33], sizes = [8, 128], strides = [1, 1]} : vector<8x166xf32> to vector<8x128xf32>
    %67 = vector.extract_strided_slice %32 {offsets = [0, 34], sizes = [8, 128], strides = [1, 1]} : vector<8x166xf32> to vector<8x128xf32>
    %68 = vector.extract_strided_slice %32 {offsets = [0, 35], sizes = [8, 128], strides = [1, 1]} : vector<8x166xf32> to vector<8x128xf32>
    %69 = vector.extract_strided_slice %32 {offsets = [0, 36], sizes = [8, 128], strides = [1, 1]} : vector<8x166xf32> to vector<8x128xf32>
    %70 = vector.extract_strided_slice %32 {offsets = [0, 37], sizes = [8, 128], strides = [1, 1]} : vector<8x166xf32> to vector<8x128xf32>
    %71 = vector.extract_strided_slice %32 {offsets = [0, 38], sizes = [8, 128], strides = [1, 1]} : vector<8x166xf32> to vector<8x128xf32>
    %72 = tpu.concatenate %33, %34, %35, %36, %37, %38, %39, %40, %41, %42, %43, %44, %45, %46, %47, %48 in 0 : vector<8x128xf32>, vector<8x128xf32>, vector<8x128xf32>, vector<8x128xf32>, vector<8x128xf32>, vector<8x128xf32>, vector<8x128xf32>, vector<8x128xf32>, vector<8x128xf32>, vector<8x128xf32>, vector<8x128xf32>, vector<8x128xf32>, vector<8x128xf32>, vector<8x128xf32>, vector<8x128xf32>, vector<8x128xf32> -> vector<128x128xf32>
    %73 = tpu.concatenate %49, %50, %51, %52, %53, %54, %55, %56, %57, %58, %59, %60, %61, %62, %63, %64 in 0 : vector<8x128xf32>, vector<8x128xf32>, vector<8x128xf32>, vector<8x128xf32>, vector<8x128xf32>, vector<8x128xf32>, vector<8x128xf32>, vector<8x128xf32>, vector<8x128xf32>, vector<8x128xf32>, vector<8x128xf32>, vector<8x128xf32>, vector<8x128xf32>, vector<8x128xf32>, vector<8x128xf32>, vector<8x128xf32> -> vector<128x128xf32>
    %74 = tpu.concatenate %65, %66, %67, %68, %69, %70, %71 in 0 : vector<8x128xf32>, vector<8x128xf32>, vector<8x128xf32>, vector<8x128xf32>, vector<8x128xf32>, vector<8x128xf32>, vector<8x128xf32> -> vector<56x128xf32>
    %75 = tpu.concatenate %72, %73, %74 in 0 : vector<128x128xf32>, vector<128x128xf32>, vector<56x128xf32> -> vector<312x128xf32>
    %cst_44 = arith.constant dense<0.000000e+00> : vector<8x128xf32>
    %76 = tpu.matmul %8, %75, %cst_44 {dimension_numbers = #tpu.dot_dimension_numbers<[1], [0], [0], [1], [0, 0, 1, 1], [], []>} : vector<8x312xf32>, vector<312x128xf32>, vector<8x128xf32> -> vector<8x128xf32>
    %77 = vector.extract_strided_slice %32 {offsets = [0, 10], sizes = [8, 128], strides = [1, 1]} : vector<8x166xf32> to vector<8x128xf32>
    %78 = vector.extract_strided_slice %32 {offsets = [0, 11], sizes = [8, 128], strides = [1, 1]} : vector<8x166xf32> to vector<8x128xf32>
    %79 = vector.extract_strided_slice %32 {offsets = [0, 12], sizes = [8, 128], strides = [1, 1]} : vector<8x166xf32> to vector<8x128xf32>
    %80 = vector.extract_strided_slice %32 {offsets = [0, 13], sizes = [8, 128], strides = [1, 1]} : vector<8x166xf32> to vector<8x128xf32>
    %81 = vector.extract_strided_slice %32 {offsets = [0, 14], sizes = [8, 128], strides = [1, 1]} : vector<8x166xf32> to vector<8x128xf32>
    %82 = vector.extract_strided_slice %32 {offsets = [0, 15], sizes = [8, 128], strides = [1, 1]} : vector<8x166xf32> to vector<8x128xf32>
    %83 = vector.extract_strided_slice %32 {offsets = [0, 16], sizes = [8, 128], strides = [1, 1]} : vector<8x166xf32> to vector<8x128xf32>
    %84 = vector.extract_strided_slice %32 {offsets = [0, 17], sizes = [8, 128], strides = [1, 1]} : vector<8x166xf32> to vector<8x128xf32>
    %85 = vector.extract_strided_slice %32 {offsets = [0, 18], sizes = [8, 128], strides = [1, 1]} : vector<8x166xf32> to vector<8x128xf32>
    %86 = vector.extract_strided_slice %32 {offsets = [0, 19], sizes = [8, 128], strides = [1, 1]} : vector<8x166xf32> to vector<8x128xf32>
    %87 = vector.extract_strided_slice %32 {offsets = [0, 20], sizes = [8, 128], strides = [1, 1]} : vector<8x166xf32> to vector<8x128xf32>
    %88 = vector.extract_strided_slice %32 {offsets = [0, 21], sizes = [8, 128], strides = [1, 1]} : vector<8x166xf32> to vector<8x128xf32>
    %89 = vector.extract_strided_slice %32 {offsets = [0, 22], sizes = [8, 128], strides = [1, 1]} : vector<8x166xf32> to vector<8x128xf32>
    %90 = vector.extract_strided_slice %32 {offsets = [0, 23], sizes = [8, 128], strides = [1, 1]} : vector<8x166xf32> to vector<8x128xf32>
    %91 = vector.extract_strided_slice %32 {offsets = [0, 24], sizes = [8, 128], strides = [1, 1]} : vector<8x166xf32> to vector<8x128xf32>
    %92 = vector.extract_strided_slice %32 {offsets = [0, 25], sizes = [8, 128], strides = [1, 1]} : vector<8x166xf32> to vector<8x128xf32>
    %93 = vector.extract_strided_slice %32 {offsets = [0, 26], sizes = [8, 128], strides = [1, 1]} : vector<8x166xf32> to vector<8x128xf32>
    %94 = vector.extract_strided_slice %32 {offsets = [0, 27], sizes = [8, 128], strides = [1, 1]} : vector<8x166xf32> to vector<8x128xf32>
    %95 = vector.extract_strided_slice %32 {offsets = [0, 28], sizes = [8, 128], strides = [1, 1]} : vector<8x166xf32> to vector<8x128xf32>
    %96 = tpu.concatenate %77, %78, %79, %80, %81, %82, %83, %84, %85, %86, %87, %88, %89, %90, %91, %92 in 0 : vector<8x128xf32>, vector<8x128xf32>, vector<8x128xf32>, vector<8x128xf32>, vector<8x128xf32>, vector<8x128xf32>, vector<8x128xf32>, vector<8x128xf32>, vector<8x128xf32>, vector<8x128xf32>, vector<8x128xf32>, vector<8x128xf32>, vector<8x128xf32>, vector<8x128xf32>, vector<8x128xf32>, vector<8x128xf32> -> vector<128x128xf32>
    %97 = tpu.concatenate %93, %94, %95 in 0 : vector<8x128xf32>, vector<8x128xf32>, vector<8x128xf32> -> vector<24x128xf32>
    %98 = tpu.concatenate %96, %97 in 0 : vector<128x128xf32>, vector<24x128xf32> -> vector<152x128xf32>
    %cst_45 = arith.constant dense<0.000000e+00> : vector<8x128xf32>
    %99 = tpu.matmul %9, %98, %cst_45 {dimension_numbers = #tpu.dot_dimension_numbers<[1], [0], [0], [1], [0, 0, 1, 1], [], []>} : vector<8x152xf32>, vector<152x128xf32>, vector<8x128xf32> -> vector<8x128xf32>
    %100 = vector.extract_strided_slice %32 {offsets = [0, 15], sizes = [8, 128], strides = [1, 1]} : vector<8x166xf32> to vector<8x128xf32>
    %101 = vector.extract_strided_slice %32 {offsets = [0, 16], sizes = [8, 128], strides = [1, 1]} : vector<8x166xf32> to vector<8x128xf32>
    %102 = vector.extract_strided_slice %32 {offsets = [0, 17], sizes = [8, 128], strides = [1, 1]} : vector<8x166xf32> to vector<8x128xf32>
    %103 = vector.extract_strided_slice %32 {offsets = [0, 18], sizes = [8, 128], strides = [1, 1]} : vector<8x166xf32> to vector<8x128xf32>
    %104 = vector.extract_strided_slice %32 {offsets = [0, 19], sizes = [8, 128], strides = [1, 1]} : vector<8x166xf32> to vector<8x128xf32>
    %105 = vector.extract_strided_slice %32 {offsets = [0, 20], sizes = [8, 128], strides = [1, 1]} : vector<8x166xf32> to vector<8x128xf32>
    %106 = vector.extract_strided_slice %32 {offsets = [0, 21], sizes = [8, 128], strides = [1, 1]} : vector<8x166xf32> to vector<8x128xf32>
    %107 = vector.extract_strided_slice %32 {offsets = [0, 22], sizes = [8, 128], strides = [1, 1]} : vector<8x166xf32> to vector<8x128xf32>
    %108 = vector.extract_strided_slice %32 {offsets = [0, 23], sizes = [8, 128], strides = [1, 1]} : vector<8x166xf32> to vector<8x128xf32>
    %109 = tpu.concatenate %100, %101, %102, %103, %104, %105, %106, %107, %108 in 0 : vector<8x128xf32>, vector<8x128xf32>, vector<8x128xf32>, vector<8x128xf32>, vector<8x128xf32>, vector<8x128xf32>, vector<8x128xf32>, vector<8x128xf32>, vector<8x128xf32> -> vector<72x128xf32>
    %cst_46 = arith.constant dense<0.000000e+00> : vector<8x128xf32>
    %110 = tpu.matmul %10, %109, %cst_46 {dimension_numbers = #tpu.dot_dimension_numbers<[1], [0], [0], [1], [0, 0, 1, 1], [], []>} : vector<8x72xf32>, vector<72x128xf32>, vector<8x128xf32> -> vector<8x128xf32>
    %111 = vector.extract_strided_slice %30 {offsets = [0, 0, 0], sizes = [1, 4, 128], strides = [1, 1, 1]} : vector<2x4x128xf32> to vector<1x4x128xf32>
    %112 = vector.shape_cast %111 : vector<1x4x128xf32> to vector<4x128xf32>
    %cst_47 = arith.constant dense<0.000000e+00> : vector<8x128xf32>
    %113 = tpu.matmul %5, %112, %cst_47 {dimension_numbers = #tpu.dot_dimension_numbers<[1], [0], [0], [1], [0, 0, 1, 1], [], []>} : vector<8x4xf32>, vector<4x128xf32>, vector<8x128xf32> -> vector<8x128xf32>
    %114 = tpu.concatenate %76, %99, %110, %113 in 0 : vector<8x128xf32>, vector<8x128xf32>, vector<8x128xf32>, vector<8x128xf32> -> vector<32x128xf32>
    %115 = vector.broadcast %6 : vector<32x1xf32> to vector<32x128xf32>
    %116 = arith.mulf %114, %115 : vector<32x128xf32>
    %117 = vector.broadcast %7 : vector<32x1xf32> to vector<32x128xf32>
    %118 = arith.addf %116, %117 : vector<32x128xf32>
    %cst_48 = arith.constant 0.000000e+00 : f32
    %119 = vector.broadcast %cst_48 : f32 to vector<32x128xf32>
    %120 = arith.maximumf %118, %119 : vector<32x128xf32>
    %c0_49 = arith.constant 0 : index
    %c0_50 = arith.constant 0 : index
    %c0_51 = arith.constant 0 : index
    %121 = vector.load %arg9[%c0_49, %c0_50, %c0_51] : memref<2x32x128xf32, #tpu.memory_space<vmem>>, vector<1x32x128xf32>
    %122 = vector.shape_cast %121 : vector<1x32x128xf32> to vector<32x128xf32>
    %123 = vector.shape_cast %120 : vector<32x128xf32> to vector<1x32x128xf32>
    tpu.vector_store %arg9[%c0_49, %c0_50, %c0_51], %123 {strides = array<i32>} : memref<2x32x128xf32, #tpu.memory_space<vmem>>, vector<1x32x128xf32>,
    %c1_52 = arith.constant 1 : index
    %c0_53 = arith.constant 0 : index
    %c0_54 = arith.constant 0 : index
    %124 = vector.load %arg10[%c1_52, %c0_53, %c0_54] : memref<2x8x166xf32, #tpu.memory_space<vmem>>, vector<1x8x166xf32>
    %125 = vector.shape_cast %124 : vector<1x8x166xf32> to vector<8x166xf32>
    %126 = vector.extract_strided_slice %125 {offsets = [0, 0], sizes = [8, 128], strides = [1, 1]} : vector<8x166xf32> to vector<8x128xf32>
    %127 = vector.extract_strided_slice %125 {offsets = [0, 1], sizes = [8, 128], strides = [1, 1]} : vector<8x166xf32> to vector<8x128xf32>
    %128 = vector.extract_strided_slice %125 {offsets = [0, 2], sizes = [8, 128], strides = [1, 1]} : vector<8x166xf32> to vector<8x128xf32>
    %129 = vector.extract_strided_slice %125 {offsets = [0, 3], sizes = [8, 128], strides = [1, 1]} : vector<8x166xf32> to vector<8x128xf32>
    %130 = vector.extract_strided_slice %125 {offsets = [0, 4], sizes = [8, 128], strides = [1, 1]} : vector<8x166xf32> to vector<8x128xf32>
    %131 = vector.extract_strided_slice %125 {offsets = [0, 5], sizes = [8, 128], strides = [1, 1]} : vector<8x166xf32> to vector<8x128xf32>
    %132 = vector.extract_strided_slice %125 {offsets = [0, 6], sizes = [8, 128], strides = [1, 1]} : vector<8x166xf32> to vector<8x128xf32>
    %133 = vector.extract_strided_slice %125 {offsets = [0, 7], sizes = [8, 128], strides = [1, 1]} : vector<8x166xf32> to vector<8x128xf32>
    %134 = vector.extract_strided_slice %125 {offsets = [0, 8], sizes = [8, 128], strides = [1, 1]} : vector<8x166xf32> to vector<8x128xf32>
    %135 = vector.extract_strided_slice %125 {offsets = [0, 9], sizes = [8, 128], strides = [1, 1]} : vector<8x166xf32> to vector<8x128xf32>
    %136 = vector.extract_strided_slice %125 {offsets = [0, 10], sizes = [8, 128], strides = [1, 1]} : vector<8x166xf32> to vector<8x128xf32>
    %137 = vector.extract_strided_slice %125 {offsets = [0, 11], sizes = [8, 128], strides = [1, 1]} : vector<8x166xf32> to vector<8x128xf32>
    %138 = vector.extract_strided_slice %125 {offsets = [0, 12], sizes = [8, 128], strides = [1, 1]} : vector<8x166xf32> to vector<8x128xf32>
    %139 = vector.extract_strided_slice %125 {offsets = [0, 13], sizes = [8, 128], strides = [1, 1]} : vector<8x166xf32> to vector<8x128xf32>
    %140 = vector.extract_strided_slice %125 {offsets = [0, 14], sizes = [8, 128], strides = [1, 1]} : vector<8x166xf32> to vector<8x128xf32>
    %141 = vector.extract_strided_slice %125 {offsets = [0, 15], sizes = [8, 128], strides = [1, 1]} : vector<8x166xf32> to vector<8x128xf32>
    %142 = vector.extract_strided_slice %125 {offsets = [0, 16], sizes = [8, 128], strides = [1, 1]} : vector<8x166xf32> to vector<8x128xf32>
    %143 = vector.extract_strided_slice %125 {offsets = [0, 17], sizes = [8, 128], strides = [1, 1]} : vector<8x166xf32> to vector<8x128xf32>
    %144 = vector.extract_strided_slice %125 {offsets = [0, 18], sizes = [8, 128], strides = [1, 1]} : vector<8x166xf32> to vector<8x128xf32>
    %145 = vector.extract_strided_slice %125 {offsets = [0, 19], sizes = [8, 128], strides = [1, 1]} : vector<8x166xf32> to vector<8x128xf32>
    %146 = vector.extract_strided_slice %125 {offsets = [0, 20], sizes = [8, 128], strides = [1, 1]} : vector<8x166xf32> to vector<8x128xf32>
    %147 = vector.extract_strided_slice %125 {offsets = [0, 21], sizes = [8, 128], strides = [1, 1]} : vector<8x166xf32> to vector<8x128xf32>
    %148 = vector.extract_strided_slice %125 {offsets = [0, 22], sizes = [8, 128], strides = [1, 1]} : vector<8x166xf32> to vector<8x128xf32>
    %149 = vector.extract_strided_slice %125 {offsets = [0, 23], sizes = [8, 128], strides = [1, 1]} : vector<8x166xf32> to vector<8x128xf32>
    %150 = vector.extract_strided_slice %125 {offsets = [0, 24], sizes = [8, 128], strides = [1, 1]} : vector<8x166xf32> to vector<8x128xf32>
    %151 = vector.extract_strided_slice %125 {offsets = [0, 25], sizes = [8, 128], strides = [1, 1]} : vector<8x166xf32> to vector<8x128xf32>
    %152 = vector.extract_strided_slice %125 {offsets = [0, 26], sizes = [8, 128], strides = [1, 1]} : vector<8x166xf32> to vector<8x128xf32>
    %153 = vector.extract_strided_slice %125 {offsets = [0, 27], sizes = [8, 128], strides = [1, 1]} : vector<8x166xf32> to vector<8x128xf32>
    %154 = vector.extract_strided_slice %125 {offsets = [0, 28], sizes = [8, 128], strides = [1, 1]} : vector<8x166xf32> to vector<8x128xf32>
    %155 = vector.extract_strided_slice %125 {offsets = [0, 29], sizes = [8, 128], strides = [1, 1]} : vector<8x166xf32> to vector<8x128xf32>
    %156 = vector.extract_strided_slice %125 {offsets = [0, 30], sizes = [8, 128], strides = [1, 1]} : vector<8x166xf32> to vector<8x128xf32>
    %157 = vector.extract_strided_slice %125 {offsets = [0, 31], sizes = [8, 128], strides = [1, 1]} : vector<8x166xf32> to vector<8x128xf32>
    %158 = vector.extract_strided_slice %125 {offsets = [0, 32], sizes = [8, 128], strides = [1, 1]} : vector<8x166xf32> to vector<8x128xf32>
    %159 = vector.extract_strided_slice %125 {offsets = [0, 33], sizes = [8, 128], strides = [1, 1]} : vector<8x166xf32> to vector<8x128xf32>
    %160 = vector.extract_strided_slice %125 {offsets = [0, 34], sizes = [8, 128], strides = [1, 1]} : vector<8x166xf32> to vector<8x128xf32>
    %161 = vector.extract_strided_slice %125 {offsets = [0, 35], sizes = [8, 128], strides = [1, 1]} : vector<8x166xf32> to vector<8x128xf32>
    %162 = vector.extract_strided_slice %125 {offsets = [0, 36], sizes = [8, 128], strides = [1, 1]} : vector<8x166xf32> to vector<8x128xf32>
    %163 = vector.extract_strided_slice %125 {offsets = [0, 37], sizes = [8, 128], strides = [1, 1]} : vector<8x166xf32> to vector<8x128xf32>
    %164 = vector.extract_strided_slice %125 {offsets = [0, 38], sizes = [8, 128], strides = [1, 1]} : vector<8x166xf32> to vector<8x128xf32>
    %165 = tpu.concatenate %126, %127, %128, %129, %130, %131, %132, %133, %134, %135, %136, %137, %138, %139, %140, %141 in 0 : vector<8x128xf32>, vector<8x128xf32>, vector<8x128xf32>, vector<8x128xf32>, vector<8x128xf32>, vector<8x128xf32>, vector<8x128xf32>, vector<8x128xf32>, vector<8x128xf32>, vector<8x128xf32>, vector<8x128xf32>, vector<8x128xf32>, vector<8x128xf32>, vector<8x128xf32>, vector<8x128xf32>, vector<8x128xf32> -> vector<128x128xf32>
    %166 = tpu.concatenate %142, %143, %144, %145, %146, %147, %148, %149, %150, %151, %152, %153, %154, %155, %156, %157 in 0 : vector<8x128xf32>, vector<8x128xf32>, vector<8x128xf32>, vector<8x128xf32>, vector<8x128xf32>, vector<8x128xf32>, vector<8x128xf32>, vector<8x128xf32>, vector<8x128xf32>, vector<8x128xf32>, vector<8x128xf32>, vector<8x128xf32>, vector<8x128xf32>, vector<8x128xf32>, vector<8x128xf32>, vector<8x128xf32> -> vector<128x128xf32>
    %167 = tpu.concatenate %158, %159, %160, %161, %162, %163, %164 in 0 : vector<8x128xf32>, vector<8x128xf32>, vector<8x128xf32>, vector<8x128xf32>, vector<8x128xf32>, vector<8x128xf32>, vector<8x128xf32> -> vector<56x128xf32>
    %168 = tpu.concatenate %165, %166, %167 in 0 : vector<128x128xf32>, vector<128x128xf32>, vector<56x128xf32> -> vector<312x128xf32>
    %cst_55 = arith.constant dense<0.000000e+00> : vector<8x128xf32>
    %169 = tpu.matmul %8, %168, %cst_55 {dimension_numbers = #tpu.dot_dimension_numbers<[1], [0], [0], [1], [0, 0, 1, 1], [], []>} : vector<8x312xf32>, vector<312x128xf32>, vector<8x128xf32> -> vector<8x128xf32>
    %170 = vector.extract_strided_slice %125 {offsets = [0, 10], sizes = [8, 128], strides = [1, 1]} : vector<8x166xf32> to vector<8x128xf32>
    %171 = vector.extract_strided_slice %125 {offsets = [0, 11], sizes = [8, 128], strides = [1, 1]} : vector<8x166xf32> to vector<8x128xf32>
    %172 = vector.extract_strided_slice %125 {offsets = [0, 12], sizes = [8, 128], strides = [1, 1]} : vector<8x166xf32> to vector<8x128xf32>
    %173 = vector.extract_strided_slice %125 {offsets = [0, 13], sizes = [8, 128], strides = [1, 1]} : vector<8x166xf32> to vector<8x128xf32>
    %174 = vector.extract_strided_slice %125 {offsets = [0, 14], sizes = [8, 128], strides = [1, 1]} : vector<8x166xf32> to vector<8x128xf32>
    %175 = vector.extract_strided_slice %125 {offsets = [0, 15], sizes = [8, 128], strides = [1, 1]} : vector<8x166xf32> to vector<8x128xf32>
    %176 = vector.extract_strided_slice %125 {offsets = [0, 16], sizes = [8, 128], strides = [1, 1]} : vector<8x166xf32> to vector<8x128xf32>
    %177 = vector.extract_strided_slice %125 {offsets = [0, 17], sizes = [8, 128], strides = [1, 1]} : vector<8x166xf32> to vector<8x128xf32>
    %178 = vector.extract_strided_slice %125 {offsets = [0, 18], sizes = [8, 128], strides = [1, 1]} : vector<8x166xf32> to vector<8x128xf32>
    %179 = vector.extract_strided_slice %125 {offsets = [0, 19], sizes = [8, 128], strides = [1, 1]} : vector<8x166xf32> to vector<8x128xf32>
    %180 = vector.extract_strided_slice %125 {offsets = [0, 20], sizes = [8, 128], strides = [1, 1]} : vector<8x166xf32> to vector<8x128xf32>
    %181 = vector.extract_strided_slice %125 {offsets = [0, 21], sizes = [8, 128], strides = [1, 1]} : vector<8x166xf32> to vector<8x128xf32>
    %182 = vector.extract_strided_slice %125 {offsets = [0, 22], sizes = [8, 128], strides = [1, 1]} : vector<8x166xf32> to vector<8x128xf32>
    %183 = vector.extract_strided_slice %125 {offsets = [0, 23], sizes = [8, 128], strides = [1, 1]} : vector<8x166xf32> to vector<8x128xf32>
    %184 = vector.extract_strided_slice %125 {offsets = [0, 24], sizes = [8, 128], strides = [1, 1]} : vector<8x166xf32> to vector<8x128xf32>
    %185 = vector.extract_strided_slice %125 {offsets = [0, 25], sizes = [8, 128], strides = [1, 1]} : vector<8x166xf32> to vector<8x128xf32>
    %186 = vector.extract_strided_slice %125 {offsets = [0, 26], sizes = [8, 128], strides = [1, 1]} : vector<8x166xf32> to vector<8x128xf32>
    %187 = vector.extract_strided_slice %125 {offsets = [0, 27], sizes = [8, 128], strides = [1, 1]} : vector<8x166xf32> to vector<8x128xf32>
    %188 = vector.extract_strided_slice %125 {offsets = [0, 28], sizes = [8, 128], strides = [1, 1]} : vector<8x166xf32> to vector<8x128xf32>
    %189 = tpu.concatenate %170, %171, %172, %173, %174, %175, %176, %177, %178, %179, %180, %181, %182, %183, %184, %185 in 0 : vector<8x128xf32>, vector<8x128xf32>, vector<8x128xf32>, vector<8x128xf32>, vector<8x128xf32>, vector<8x128xf32>, vector<8x128xf32>, vector<8x128xf32>, vector<8x128xf32>, vector<8x128xf32>, vector<8x128xf32>, vector<8x128xf32>, vector<8x128xf32>, vector<8x128xf32>, vector<8x128xf32>, vector<8x128xf32> -> vector<128x128xf32>
    %190 = tpu.concatenate %186, %187, %188 in 0 : vector<8x128xf32>, vector<8x128xf32>, vector<8x128xf32> -> vector<24x128xf32>
    %191 = tpu.concatenate %189, %190 in 0 : vector<128x128xf32>, vector<24x128xf32> -> vector<152x128xf32>
    %cst_56 = arith.constant dense<0.000000e+00> : vector<8x128xf32>
    %192 = tpu.matmul %9, %191, %cst_56 {dimension_numbers = #tpu.dot_dimension_numbers<[1], [0], [0], [1], [0, 0, 1, 1], [], []>} : vector<8x152xf32>, vector<152x128xf32>, vector<8x128xf32> -> vector<8x128xf32>
    %193 = vector.extract_strided_slice %125 {offsets = [0, 15], sizes = [8, 128], strides = [1, 1]} : vector<8x166xf32> to vector<8x128xf32>
    %194 = vector.extract_strided_slice %125 {offsets = [0, 16], sizes = [8, 128], strides = [1, 1]} : vector<8x166xf32> to vector<8x128xf32>
    %195 = vector.extract_strided_slice %125 {offsets = [0, 17], sizes = [8, 128], strides = [1, 1]} : vector<8x166xf32> to vector<8x128xf32>
    %196 = vector.extract_strided_slice %125 {offsets = [0, 18], sizes = [8, 128], strides = [1, 1]} : vector<8x166xf32> to vector<8x128xf32>
    %197 = vector.extract_strided_slice %125 {offsets = [0, 19], sizes = [8, 128], strides = [1, 1]} : vector<8x166xf32> to vector<8x128xf32>
    %198 = vector.extract_strided_slice %125 {offsets = [0, 20], sizes = [8, 128], strides = [1, 1]} : vector<8x166xf32> to vector<8x128xf32>
    %199 = vector.extract_strided_slice %125 {offsets = [0, 21], sizes = [8, 128], strides = [1, 1]} : vector<8x166xf32> to vector<8x128xf32>
    %200 = vector.extract_strided_slice %125 {offsets = [0, 22], sizes = [8, 128], strides = [1, 1]} : vector<8x166xf32> to vector<8x128xf32>
    %201 = vector.extract_strided_slice %125 {offsets = [0, 23], sizes = [8, 128], strides = [1, 1]} : vector<8x166xf32> to vector<8x128xf32>
    %202 = tpu.concatenate %193, %194, %195, %196, %197, %198, %199, %200, %201 in 0 : vector<8x128xf32>, vector<8x128xf32>, vector<8x128xf32>, vector<8x128xf32>, vector<8x128xf32>, vector<8x128xf32>, vector<8x128xf32>, vector<8x128xf32>, vector<8x128xf32> -> vector<72x128xf32>
    %cst_57 = arith.constant dense<0.000000e+00> : vector<8x128xf32>
    %203 = tpu.matmul %10, %202, %cst_57 {dimension_numbers = #tpu.dot_dimension_numbers<[1], [0], [0], [1], [0, 0, 1, 1], [], []>} : vector<8x72xf32>, vector<72x128xf32>, vector<8x128xf32> -> vector<8x128xf32>
    %204 = vector.extract_strided_slice %30 {offsets = [1, 0, 0], sizes = [1, 4, 128], strides = [1, 1, 1]} : vector<2x4x128xf32> to vector<1x4x128xf32>
    %205 = vector.shape_cast %204 : vector<1x4x128xf32> to vector<4x128xf32>
    %cst_58 = arith.constant dense<0.000000e+00> : vector<8x128xf32>
    %206 = tpu.matmul %5, %205, %cst_58 {dimension_numbers = #tpu.dot_dimension_numbers<[1], [0], [0], [1], [0, 0, 1, 1], [], []>} : vector<8x4xf32>, vector<4x128xf32>, vector<8x128xf32> -> vector<8x128xf32>
    %207 = tpu.concatenate %169, %192, %203, %206 in 0 : vector<8x128xf32>, vector<8x128xf32>, vector<8x128xf32>, vector<8x128xf32> -> vector<32x128xf32>
    %208 = vector.broadcast %6 : vector<32x1xf32> to vector<32x128xf32>
    %209 = arith.mulf %207, %208 : vector<32x128xf32>
    %210 = vector.broadcast %7 : vector<32x1xf32> to vector<32x128xf32>
    %211 = arith.addf %209, %210 : vector<32x128xf32>
    %cst_59 = arith.constant 0.000000e+00 : f32
    %212 = vector.broadcast %cst_59 : f32 to vector<32x128xf32>
    %213 = arith.maximumf %211, %212 : vector<32x128xf32>
    %c1_60 = arith.constant 1 : index
    %c0_61 = arith.constant 0 : index
    %c0_62 = arith.constant 0 : index
    %214 = vector.load %arg9[%c1_60, %c0_61, %c0_62] : memref<2x32x128xf32, #tpu.memory_space<vmem>>, vector<1x32x128xf32>
    %215 = vector.shape_cast %214 : vector<1x32x128xf32> to vector<32x128xf32>
    %216 = vector.shape_cast %213 : vector<32x128xf32> to vector<1x32x128xf32>
    tpu.vector_store %arg9[%c1_60, %c0_61, %c0_62], %216 {strides = array<i32>} : memref<2x32x128xf32, #tpu.memory_space<vmem>>, vector<1x32x128xf32>,
    return
  }
  func.func @transform_0(%arg0: i32) -> (i32, i32, i32) {
    %c0_i32 = arith.constant 0 : i32
    %c0_i32_0 = arith.constant 0 : i32
    %c0_i32_1 = arith.constant 0 : i32
    %c0_i32_2 = arith.constant 0 : i32
    return %c0_i32, %c0_i32_0, %c0_i32_1 : i32, i32, i32
  }
  func.func @transform_1(%arg0: i32) -> (i32, i32) {
    %c0_i32 = arith.constant 0 : i32
    %c0_i32_0 = arith.constant 0 : i32
    %c0_i32_1 = arith.constant 0 : i32
    return %c0_i32, %c0_i32_0 : i32, i32
  }
  func.func @transform_2(%arg0: i32) -> (i32, i32) {
    %c0_i32 = arith.constant 0 : i32
    %c0_i32_0 = arith.constant 0 : i32
    %c0_i32_1 = arith.constant 0 : i32
    return %c0_i32, %c0_i32_0 : i32, i32
  }
  func.func @transform_3(%arg0: i32) -> (i32, i32) {
    %c0_i32 = arith.constant 0 : i32
    %c0_i32_0 = arith.constant 0 : i32
    %c0_i32_1 = arith.constant 0 : i32
    return %c0_i32, %c0_i32_0 : i32, i32
  }
  func.func @transform_4(%arg0: i32) -> (i32, i32) {
    %c0_i32 = arith.constant 0 : i32
    %c0_i32_0 = arith.constant 0 : i32
    %c0_i32_1 = arith.constant 0 : i32
    return %c0_i32, %c0_i32_0 : i32, i32
  }
  func.func @transform_5(%arg0: i32) -> (i32, i32) {
    %c0_i32 = arith.constant 0 : i32
    %c0_i32_0 = arith.constant 0 : i32
    %c0_i32_1 = arith.constant 0 : i32
    return %c0_i32, %c0_i32_0 : i32, i32
  }
  func.func @transform_6(%arg0: i32) -> (i32, i32) {
    %c0_i32 = arith.constant 0 : i32
    %c0_i32_0 = arith.constant 0 : i32
    %c0_i32_1 = arith.constant 0 : i32
    return %c0_i32, %c0_i32_0 : i32, i32
  }
  func.func @transform_7(%arg0: i32) -> (i32, i32) {
    %c0_i32 = arith.constant 0 : i32
    %c0_i32_0 = arith.constant 0 : i32
    %c0_i32_1 = arith.constant 0 : i32
    return %c0_i32, %c0_i32_0 : i32, i32
  }
  func.func @transform_8(%arg0: i32) -> (i32, i32, i32) {
    %c0_i32 = arith.constant 0 : i32
    %c0_i32_0 = arith.constant 0 : i32
    %c0_i32_1 = arith.constant 0 : i32
    %c0_i32_2 = arith.constant 0 : i32
    return %c0_i32, %c0_i32_0, %c0_i32_1 : i32, i32, i32
  }
}

</mosaic_0001>

<bundles_post_ra>
// kernel: tpu_custom_call.1
= control target key start
LH: loop header
LB: loop body
LE: loop exit
PB: predicated region body
PF: predicated region fallthrough
CT: control target
= control target key end

     0   :  { %vm35_vm0 = vcmask 1043456   ;;  %s2068_s9 = smov 1   ;;  %vm3100_vm1 = vcmask 31744   ;;  %v2069_v6 = vmov 0   ;;  %s3091_s0 = inlined_call_operand.vmem [shape: f32[2,4,128], index: 0, kind: input, shape index: {}]   ;;  %s3092_s1 = inlined_call_operand.vmem [shape: f32[8,4], index: 1, kind: input, shape index: {}]   ;;  %s3093_s2 = inlined_call_operand.vmem [shape: f32[8,312], index: 2, kind: input, shape index: {}]   ;;  %s3094_s3 = inlined_call_operand.vmem [shape: f32[8,152], index: 3, kind: input, shape index: {}]   ;;  %s3095_s4 = inlined_call_operand.vmem [shape: f32[8,72], index: 4, kind: input, shape index: {}]   ;;  %s3096_s5 = inlined_call_operand.vmem [shape: f32[8,4], index: 5, kind: input, shape index: {}]   ;;  %s3097_s6 = inlined_call_operand.vmem [shape: f32[32,1], index: 6, kind: input, shape index: {}]   ;;  %s3098_s7 = inlined_call_operand.vmem [shape: f32[32,1], index: 7, kind: input, shape index: {}]   ;;  %s3099_s8 = inlined_call_operand.hbm [shape: f32[2,32,128], index: 8, kind: output, shape index: {}]  }
   0x1   :  { %v124_v0 = vld [vmem:[%s3091_s0] sm:$0xf]  ;;  %v1359_v3 = vld [vmem:[%s3091_s0 + $0x4] sm:$0xf]  ;;  %v44_v4 = vld [vmem:[%s3097_s6 + $0x10] sm:$0xff]  ;;  %1399 = vset.pattern.permute.xlu2 %v2069_v6 }
   0x2   :  { %v56_v1 = vld [vmem:[%s3091_s0] sm:$0xf]  ;;  %128 = vrot.lane.b32.xlu1 %v124_v0, %s2068_s9  ;;  %1360 = vmatpush.msk.msra.mxu1 %vm35_vm0, %v1359_v3 }
   0x3   :  { %1357 = vmatpush.msk.msra.mxu0 %vm35_vm0, %v56_v1  ;;  %v40_v2 = vld [vmem:[%s3092_s1] sm:$0xff] }
   0x4   :  { %1358 = vmatmul.msk.f32.vlgmr.msra.gmra.mxu0 %vm3100_vm1, %v40_v2  ;;  %v42_v5 = vld [vmem:[%s3097_s6] sm:$0xff]  ;;  %1361 = vmatmul.msk.f32.vlgmr.msra.gmra.mxu1 %vm3100_vm1, %v40_v2 }
   0x5   :  { %13 = vsyncpa [#allocation5], 0  ;;  %1397 = vset.pattern.permute.xlu0 %v2069_v6  ;;  %747 = vperm.xlu2 %1399, %v44_v4   ;;  %v125_v7 = vld [vmem:[%s3091_s0 + $0x4] sm:$0xf]  ;;  %v47_v9 = vld [vmem:[%s3098_s7 + $0x8] sm:$0xff]  ;;  %vm36_vm2 = vcmask 15364  }
   0x6   :  { %737 = vperm.xlu0 %1397, %v42_v5   ;;  %1398 = vset.pattern.permute.xlu1 %v2069_v6  ;;  %v46_v8 = vld [vmem:[%s3098_s7] sm:$0xff]  ;;  %vm37_vm3 = vmor %vm36_vm2, %vm35_vm0  ;;  %v2070_v10 = vmov -3.4028235e+38   ;;  %v49_v11 = vld [vmem:[%s3098_s7 + $0x18] sm:$0xff]  ;;  %vm139_vm4 = vcmask 1043464   ;;  %vm140_vm5 = vcmask 7172  }
   0x7   :  { %38 = vst.msk [vmem:[#allocation3] sm:$0xff] %vm37_vm3, %v2070_v10  ;;  %v43_v12 = vld [vmem:[%s3097_s6 + $0x8] sm:$0xff]  ;;  %v45_v13 = vld [vmem:[%s3097_s6 + $0x18] sm:$0xff]  ;;  %v48_v14 = vld [vmem:[%s3098_s7 + $0x10] sm:$0xff]  ;;  %vm134_vm6 = vcmask 7168   ;;  %s2071_s30 = smov 126  }
   0x8   :  { %39 = vst.msk [vmem:[#allocation3 + $0x8] sm:$0xff] %vm37_vm3, %v2070_v10  ;;  %vm141_vm7 = vmor %vm140_vm5, %vm139_vm4  ;;  %s2072_s6 = smov 127   ;;  %s2073_s7 = smov 19   ;;  %vm31_vm8 = vcmask 310272   ;;  %v2074_v27 = vmov 0.0   ;;  %vm154_vm9 = vcmask 1039360  }
   0x9   :  { %30 = vst [vmem:[#allocation2] sm:$0xff] %v2074_v27  ;;  %vm167_vm10 = vcmask 1031168   ;;  %vm88_vm11 = vcmask 1047704   ;;  %vm90_vm12 = vcmask 154624   ;;  %s2076_s10 = smov 122   ;;  %s2077_s11 = smov 123  }
   0xa   :  { %130 = vrot.lane.b32.xlu1 %v125_v7, %s2068_s9  ;;  %32 = vst.msk [vmem:[#allocation2 + $0x8] sm:$0xff] %vm31_vm8, %v2074_v27  ;;  %s2075_s9 = smov 125   ;;  %s2078_s12 = smov 124   ;;  %vm201_vm13 = vcmask 1014784   ;;  %vm222_vm14 = vcmask 990208   ;;  %vm194_vm15 = vcmask 1022976  }
   0xb   :  { %33 = vst [vmem:[#allocation2 + $0x10] sm:$0xff] %v2074_v27  ;;  %s2079_s13 = smov 119   ;;  %s2080_s14 = smov 120   ;;  %vm243_vm2 = vcmask 965632   ;;  %vm215_vm3 = vcmask 998400   ;;  %vm208_vm4 = vcmask 1006592  }
   0xc   :  { %34 = vst.msk [vmem:[#allocation2 + $0x18] sm:$0xff] %vm31_vm8, %v2074_v27  ;;  %s2081_s15 = smov 121   ;;  %s2082_s16 = smov 116   ;;  %vm264_vm5 = vcmask 941056   ;;  %vm250_vm8 = vcmask 957440   ;;  %vm271_vm1 = vcmask 932864  }
   0xd   :  { %761 = vperm.xlu2 %1399, %v46_v8   ;;  %s2083_s17 = smov 117   ;;  %s2084_s1 = smov 118  }
   0xe   :  { %766 = vperm.xlu0 %1397, %v47_v9   ;;  %s2085_s18 = smov 113   ;;  %s2086_s19 = smov 114  }
   0xf   :  { %s2087_s20 = smov 115   ;;  %s2088_s21 = smov 96  }
  0x10   :  { %s2089_s22 = smov 112  }
  0x12   :  { %742 = vperm.xlu1 %1398, %v43_v12  }
  0x15   :  { %776 = vperm.xlu2 %1399, %v49_v11  }
  0x1a   :  { %752 = vperm.xlu1 %1398, %v45_v13  }
  0x22   :  { %771 = vperm.xlu1 %1398, %v48_v14  }
  0x5f   :  { %v2186_v25 = vpop.permute.xlu2 %747 }
  0x60   :  { %3114 = vst [vmem:[#allocation7_spill] sm:$0xff] %v2186_v25 }
  0x67   :  { %v2188_v26 = vpop.permute.xlu2 %761 }
  0x68   :  { %3115 = vst [vmem:[#allocation8_spill] sm:$0xff] %v2188_v26 }
  0x6f   :  { %v2190_v28 = vpop.permute.xlu2 %776 }
  0x70   :  { %3116 = vst [vmem:[#allocation9_spill] sm:$0xff] %v2190_v28 }
  0x74   :  { %v129_v15 = vpop.permute.xlu1 %128 }
  0x75   :  { %v132_v16 = vrot.slane %v129_v15, 4 }
  0x77   :  { %v135_v17 = vsel %vm134_vm6, %v132_v16, %v129_v15 }
  0x78   :  { %142 = vst.msk [vmem:[#allocation3] sm:$0xff] %vm141_vm7, %v135_v17  ;;  %v2192_v29 = vpop.permute.xlu0 %737 }
  0x79   :  { %3117 = vst [vmem:[#allocation10_spill] sm:$0xff] %v2192_v29  ;;  %v2592_v29 = vld [vmem:[%s3093_s2] sm:$0xff] }
  0x7c   :  { %v131_v18 = vpop.permute.xlu1 %130 }
  0x7d   :  { %v133_v19 = vrot.slane %v131_v18, 4 }
  0x7f   :  { %v144_v20 = vld [vmem:[#allocation3] sm:$0xff]  ;;  %v136_v21 = vsel %vm134_vm6, %v133_v19, %v131_v18  ;;  %vm229_vm6 = vcmask 982016  }
  0x80   :  { %161 = vrot.lane.b32.xlu0 %v144_v20, %s2071_s30  ;;  %148 = vrot.lane.b32.xlu2 %v144_v20, %s2072_s6  ;;  %143 = vst.msk [vmem:[#allocation3 + $0x8] sm:$0xff] %vm141_vm7, %v136_v21  ;;  %v2194_v31 = vpop.permute.xlu0 %766  ;;  %vm236_vm7 = vcmask 973824  }
  0x81   :  { %v81_v22 = vpop.f32.mrf.mxu0  ;;  %v114_v24 = vpop.f32.mrf.mxu1  ;;  %3118 = vst [vmem:[#allocation11_spill] sm:$0xff] %v2194_v31 }
  0x84   :  { %v2224_v47 = vpop.permute.xlu1 %742 }
  0x85   :  { %3120 = vst [vmem:[#allocation13_spill] sm:$0xff] %v2224_v47 }
  0x87   :  { %v145_v23 = vld [vmem:[#allocation3 + $0x8] sm:$0xff] }
  0x88   :  { %85 = vrot.lane.b32.xlu0 %v81_v22, %s2073_s7  ;;  %163 = vrot.lane.b32.xlu1 %v145_v23, %s2071_s30 }
  0x89   :  { %150 = vrot.lane.b32.xlu2 %v145_v23, %s2072_s6 }
  0x8c   :  { %v2229_v49 = vpop.permute.xlu1 %752 }
  0x8d   :  { %3121 = vst [vmem:[#allocation14_spill] sm:$0xff] %v2229_v49 }
  0x90   :  { %118 = vrot.lane.b32.xlu0 %v114_v24, %s2073_s7 }
  0x94   :  { %v2239_v55 = vpop.permute.xlu1 %771 }
  0x95   :  { %3122 = vst [vmem:[#allocation15_spill] sm:$0xff] %v2239_v55 }
  0xda   :  { %v149_v30 = vpop.permute.xlu2 %148 }
  0xdb   :  { %v152_v32 = vrot.slane %v149_v30, 4 }
  0xdd   :  { %v155_v33 = vsel %vm154_vm9, %v149_v30, %v152_v32 }
  0xde   :  { %v159_v36 = vmax.f32 %v144_v20, %v155_v33 }
  0xe3   :  { %v2227_v48 = vpop.permute.xlu2 %150 }
  0xf2   :  { %v162_v34 = vpop.permute.xlu0 %161 }
  0xf3   :  { %v165_v35 = vrot.slane %v162_v34, 4 }
  0xf5   :  { %v168_v37 = vsel %vm167_vm10, %v162_v34, %v165_v35 }
  0xf6   :  { %v2198_v38 = vmax.f32 %v159_v36, %v168_v37 }
  0xf8   :  { %3119 = vst [vmem:[#allocation12_spill] sm:$0xff] %v2198_v38 }
  0xfa   :  { %v86_v39 = vpop.permute.xlu0 %85  ;;  %v2251_v61 = vpop.permute.xlu1 %163 }
  0xfb   :  { %89 = vst.msk [vmem:[#allocation2] sm:$0xff] %vm88_vm11, %v86_v39 }
  0xfc   :  { %91 = vst.msk [vmem:[#allocation2 + $0x8] sm:$0xff] %vm90_vm12, %v86_v39 }
 0x102   :  { %v2200_v40 = vld [vmem:[#allocation2] sm:$0xff]  ;;  %v119_v43 = vpop.permute.xlu0 %118 }
 0x103   :  { %v175_v41 = vld [vmem:[#allocation2 + $0x8] sm:$0xff]  ;;  %122 = vst.msk [vmem:[#allocation2 + $0x10] sm:$0xff] %vm88_vm11, %v119_v43  ;;  %vm257_vm11 = vcmask 949248  }
 0x104   :  { %v1410_v42 = vpack.i.bf16 %v175_v41, %v2200_v40  ;;  %123 = vst.msk [vmem:[#allocation2 + $0x18] sm:$0xff] %vm90_vm12, %v119_v43  ;;  %vm278_vm12 = vcmask 924672  }
 0x106   :  { %1411 = vrot.lane.b32.xlu1 %v1410_v42, %s2075_s9  ;;  %1406 = vrot.lane.b32.xlu0 %v1410_v42, %s2071_s30 }
 0x107   :  { %1401 = vrot.lane.b32.xlu2 %v1410_v42, %s2072_s6 }
 0x10a   :  { %v791_v44 = vld [vmem:[#allocation2 + $0x10] sm:$0xff] }
 0x10b   :  { %v792_v45 = vld [vmem:[#allocation2 + $0x18] sm:$0xff] }
 0x10c   :  { %v1490_v46 = vpack.i.bf16 %v792_v45, %v791_v44 }
 0x10e   :  { %1426 = vrot.lane.b32.xlu1 %v1410_v42, %s2076_s10  ;;  %1421 = vrot.lane.b32.xlu0 %v1410_v42, %s2077_s11 }
 0x10f   :  { %1416 = vrot.lane.b32.xlu2 %v1410_v42, %s2078_s12 }
 0x116   :  { %1441 = vrot.lane.b32.xlu1 %v1410_v42, %s2079_s13  ;;  %1436 = vrot.lane.b32.xlu0 %v1410_v42, %s2080_s14 }
 0x117   :  { %1431 = vrot.lane.b32.xlu2 %v1410_v42, %s2081_s15 }
 0x11e   :  { %1456 = vrot.lane.b32.xlu1 %v1410_v42, %s2082_s16  ;;  %1451 = vrot.lane.b32.xlu0 %v1410_v42, %s2083_s17 }
 0x11f   :  { %1446 = vrot.lane.b32.xlu2 %v1410_v42, %s2084_s1 }
 0x126   :  { %1471 = vrot.lane.b32.xlu1 %v1410_v42, %s2085_s18  ;;  %1466 = vrot.lane.b32.xlu0 %v1410_v42, %s2086_s19 }
 0x127   :  { %1461 = vrot.lane.b32.xlu2 %v1410_v42, %s2087_s20 }
 0x12e   :  { %1481 = vrot.lane.b32.xlu0 %v1410_v42, %s2088_s21  ;;  %1491 = vrot.lane.b32.xlu1 %v1490_v46, %s2071_s30 }
 0x12f   :  { %1476 = vrot.lane.b32.xlu2 %v1410_v42, %s2089_s22 }
 0x136   :  { %1486 = vrot.lane.b32.xlu0 %v1490_v46, %s2072_s6  ;;  %1506 = vrot.lane.b32.xlu1 %v1490_v46, %s2077_s11 }
 0x137   :  { %1496 = vrot.lane.b32.xlu2 %v1490_v46, %s2075_s9 }
 0x13e   :  { %1501 = vrot.lane.b32.xlu0 %v1490_v46, %s2078_s12  ;;  %1521 = vrot.lane.b32.xlu1 %v1490_v46, %s2080_s14  ;;  %s1345_s12 = sshll.u32 %s3099_s8, 4  ;;  %s2092_s14 = smov 8   ;;  %s1346_s12 = int_to_ptr.hbm [resolvable:$true] %s1345_s12 }
 0x13f   :  { %1511 = vrot.lane.b32.xlu2 %v1490_v46, %s2076_s10 }
 0x146   :  { %1516 = vrot.lane.b32.xlu0 %v1490_v46, %s2081_s15  ;;  %1536 = vrot.lane.b32.xlu1 %v1490_v46, %s2083_s17 }
 0x147   :  { %1526 = vrot.lane.b32.xlu2 %v1490_v46, %s2079_s13  ;;  %s2091_s13 = smov 128  }
 0x14e   :  { %1531 = vrot.lane.b32.xlu0 %v1490_v46, %s2084_s1  ;;  %1551 = vrot.lane.b32.xlu1 %v1490_v46, %s2086_s19 }
 0x14f   :  { %1541 = vrot.lane.b32.xlu2 %v1490_v46, %s2082_s16 }
 0x156   :  { %1546 = vrot.lane.b32.xlu0 %v1490_v46, %s2087_s20 }
 0x157   :  { %1556 = vrot.lane.b32.xlu2 %v1490_v46, %s2085_s18 }
 0x15e   :  { %1561 = vrot.lane.b32.xlu0 %v1490_v46, %s2089_s22 }
 0x15f   :  { %1566 = vrot.lane.b32.xlu2 %v1490_v46, %s2088_s21 }
 0x161   :  { %v1402_v50 = vpop.permute.xlu2 %1401 }
 0x162   :  { %v1404_v51 = vunpack.i.h.bf16 %v1402_v50  ;;  %v1403_v52 = vunpack.i.l.bf16 %v1402_v50 }
 0x164   :  { %v2234_v53 = vsel %vm154_vm9, %v1403_v52, %v1404_v51 }
 0x165   :  { %v2237_v54 = vpack.i.bf16 %v1404_v51, %v2234_v53 }
 0x167   :  { %1571 = vrot.lane.b32.xlu0 %v2237_v54, %s2089_s22 }
 0x169   :  { %v1417_v56 = vpop.permute.xlu2 %1416 }
 0x16a   :  { %v1419_v57 = vunpack.i.h.bf16 %v1417_v56  ;;  %v1418_v58 = vunpack.i.l.bf16 %v1417_v56 }
 0x16c   :  { %v2244_v59 = vsel %vm201_vm13, %v1418_v58, %v1419_v57 }
 0x16d   :  { %v2247_v60 = vpack.i.bf16 %v1419_v57, %v2244_v59 }
 0x16f   :  { %1586 = vrot.lane.b32.xlu0 %v2247_v60, %s2089_s22 }
 0x171   :  { %v1432_v62 = vpop.permute.xlu2 %1431 }
 0x172   :  { %v1434_v63 = vunpack.i.h.bf16 %v1432_v62  ;;  %v1433_v0 = vunpack.i.l.bf16 %v1432_v62 }
 0x174   :  { %v2254_v1 = vsel %vm222_vm14, %v1433_v0, %v1434_v63 }
 0x175   :  { %v2257_v2 = vpack.i.bf16 %v1434_v63, %v2254_v1 }
 0x177   :  { %1601 = vrot.lane.b32.xlu0 %v2257_v2, %s2089_s22 }
 0x178   :  { %v1412_v3 = vpop.permute.xlu1 %1411  ;;  %v1407_v4 = vpop.permute.xlu0 %1406 }
 0x179   :  { %v1414_v5 = vunpack.i.h.bf16 %v1412_v3  ;;  %v1413_v6 = vunpack.i.l.bf16 %v1412_v3  ;;  %v1409_v7 = vunpack.i.h.bf16 %v1407_v4  ;;  %v1408_v8 = vunpack.i.l.bf16 %v1407_v4  ;;  %v1447_v9 = vpop.permute.xlu2 %1446 }
 0x17a   :  { %v1449_v10 = vunpack.i.h.bf16 %v1447_v9  ;;  %v1448_v11 = vunpack.i.l.bf16 %v1447_v9 }
 0x17b   :  { %v2262_v12 = vsel %vm194_vm15, %v1413_v6, %v1414_v5  ;;  %v2265_v13 = vsel %vm167_vm10, %v1408_v8, %v1409_v7 }
 0x17c   :  { %v2268_v14 = vsel %vm243_vm2, %v1448_v11, %v1449_v10  ;;  %v2271_v15 = vpack.i.bf16 %v1409_v7, %v2265_v13  ;;  %v2274_v16 = vpack.i.bf16 %v1414_v5, %v2262_v12 }
 0x17d   :  { %3123 = vst [vmem:[#allocation16_spill] sm:$0xff] %v2268_v14  ;;  %v2277_v17 = vpack.i.bf16 %v1449_v10, %v2268_v14 }
 0x17e   :  { %1576 = vrot.lane.b32.xlu1 %v2271_v15, %s2089_s22  ;;  %1581 = vrot.lane.b32.xlu2 %v2274_v16, %s2089_s22 }
 0x17f   :  { %1616 = vrot.lane.b32.xlu0 %v2277_v17, %s2089_s22 }
 0x180   :  { %v1427_v18 = vpop.permute.xlu1 %1426  ;;  %v1422_v19 = vpop.permute.xlu0 %1421 }
 0x181   :  { %v1429_v20 = vunpack.i.h.bf16 %v1427_v18  ;;  %v1428_v21 = vunpack.i.l.bf16 %v1427_v18  ;;  %v1424_v22 = vunpack.i.h.bf16 %v1422_v19  ;;  %v1423_v23 = vunpack.i.l.bf16 %v1422_v19  ;;  %v1462_v24 = vpop.permute.xlu2 %1461 }
 0x182   :  { %v1464_v27 = vunpack.i.h.bf16 %v1462_v24  ;;  %v1463_v30 = vunpack.i.l.bf16 %v1462_v24 }
 0x183   :  { %v2286_v32 = vsel %vm215_vm3, %v1428_v21, %v1429_v20  ;;  %v2289_v33 = vsel %vm208_vm4, %v1423_v23, %v1424_v22 }
 0x184   :  { %v2292_v34 = vpack.i.bf16 %v1424_v22, %v2289_v33  ;;  %v2295_v35 = vpack.i.bf16 %v1429_v20, %v2286_v32  ;;  %v265_v36 = vsel %vm264_vm5, %v1463_v30, %v1464_v27 }
 0x185   :  { %v2298_v37 = vpack.i.bf16 %v1464_v27, %v265_v36 }
 0x186   :  { %1591 = vrot.lane.b32.xlu1 %v2292_v34, %s2089_s22  ;;  %1596 = vrot.lane.b32.xlu2 %v2295_v35, %s2089_s22 }
 0x187   :  { %1631 = vrot.lane.b32.xlu0 %v2298_v37, %s2089_s22 }
 0x188   :  { %v1442_v39 = vpop.permute.xlu1 %1441  ;;  %v1437_v41 = vpop.permute.xlu0 %1436 }
 0x189   :  { %v1444_v42 = vunpack.i.h.bf16 %v1442_v39  ;;  %v1443_v43 = vunpack.i.l.bf16 %v1442_v39  ;;  %v1439_v44 = vunpack.i.h.bf16 %v1437_v41  ;;  %v1438_v45 = vunpack.i.l.bf16 %v1437_v41  ;;  %v2317_v5 = vpop.permute.xlu2 %1476 }
 0x18b   :  { %v230_v46 = vsel %vm229_vm6, %v1438_v45, %v1439_v44  ;;  %v237_v50 = vsel %vm236_vm7, %v1443_v43, %v1444_v42 }
 0x18c   :  { %v2308_v51 = vpack.i.bf16 %v1439_v44, %v230_v46  ;;  %v1610_v52 = vpack.i.bf16 %v1444_v42, %v237_v50 }
 0x18e   :  { %1606 = vrot.lane.b32.xlu1 %v2308_v51, %s2089_s22  ;;  %1611 = vrot.lane.b32.xlu2 %v1610_v52, %s2089_s22 }
 0x18f   :  { %1656 = vrot.lane.b32.xlu0 %v2274_v16, %s2088_s21 }
 0x190   :  { %v1457_v56 = vpop.permute.xlu1 %1456  ;;  %v1452_v57 = vpop.permute.xlu0 %1451 }
 0x191   :  { %v1459_v58 = vunpack.i.h.bf16 %v1457_v56  ;;  %v1458_v62 = vunpack.i.l.bf16 %v1457_v56  ;;  %v1454_v63 = vunpack.i.h.bf16 %v1452_v57  ;;  %v1453_v0 = vunpack.i.l.bf16 %v1452_v57  ;;  %v1497_v24 = vpop.permute.xlu2 %1496 }
 0x192   :  { %v1499_v45 = vunpack.i.h.bf16 %v1497_v24  ;;  %v1479_v57 = vunpack.i.h.bf16 %v2317_v5 }
 0x193   :  { %v251_v3 = vsel %vm250_vm8, %v1453_v0, %v1454_v63  ;;  %v258_v4 = vsel %vm257_vm11, %v1458_v62, %v1459_v58 }
 0x194   :  { %v2319_v6 = vpack.i.bf16 %v1454_v63, %v251_v3  ;;  %v1625_v7 = vpack.i.bf16 %v1459_v58, %v258_v4  ;;  %v1478_v58 = vunpack.i.l.bf16 %v2317_v5 }
 0x196   :  { %1621 = vrot.lane.b32.xlu1 %v2319_v6, %s2089_s22  ;;  %1626 = vrot.lane.b32.xlu2 %v1625_v7, %s2089_s22 }
 0x197   :  { %1671 = vrot.lane.b32.xlu0 %v2295_v35, %s2088_s21 }
 0x198   :  { %v1472_v8 = vpop.permute.xlu1 %1471  ;;  %v1467_v9 = vpop.permute.xlu0 %1466 }
 0x199   :  { %v1474_v10 = vunpack.i.h.bf16 %v1472_v8  ;;  %v1473_v11 = vunpack.i.l.bf16 %v1472_v8  ;;  %v1469_v18 = vunpack.i.h.bf16 %v1467_v9  ;;  %v1468_v19 = vunpack.i.l.bf16 %v1467_v9  ;;  %v1512_v30 = vpop.permute.xlu2 %1511 }
 0x19a   :  { %v1514_v62 = vunpack.i.h.bf16 %v1512_v30  ;;  %v1513_v63 = vunpack.i.l.bf16 %v1512_v30 }
 0x19b   :  { %v2327_v20 = vsel %vm278_vm12, %v1473_v11, %v1474_v10  ;;  %v272_v21 = vsel %vm271_vm1, %v1468_v19, %v1469_v18 }
 0x19c   :  { %3124 = vst [vmem:[#allocation17_spill] sm:$0xff] %v2327_v20  ;;  %425 = vmatpush.msra.mxu2 %v2327_v20  ;;  %v2331_v22 = vpack.i.bf16 %v1469_v18, %v272_v21  ;;  %v1640_v23 = vpack.i.bf16 %v1474_v10, %v2327_v20 }
 0x19e   :  { %426 = vmatpush.msra.mxu2 %v272_v21  ;;  %1636 = vrot.lane.b32.xlu1 %v2331_v22, %s2089_s22 }
 0x19f   :  { %1641 = vrot.lane.b32.xlu2 %v1640_v23, %s2089_s22  ;;  %1686 = vrot.lane.b32.xlu0 %v2274_v16, %s2084_s1 }
 0x1a0   :  { %v2339_v27 = vpop.permute.xlu0 %1481  ;;  %427 = vmatpush.msra.mxu2 %v265_v36 }
 0x1a1   :  { %v1527_v41 = vpop.permute.xlu2 %1526 }
 0x1a2   :  { %428 = vmatpush.msra.mxu2 %v258_v4  ;;  %v2431_v4 = vsel %vm215_vm3, %v1513_v63, %v1514_v62 }
 0x1a4   :  { %429 = vmatpush.msra.mxu2 %v251_v3 }
 0x1a6   :  { %430 = vmatpush.msra.mxu2 %v2268_v14  ;;  %1646 = vrot.lane.b32.xlu1 %v2237_v54, %s2088_s21 }
 0x1a7   :  { %1651 = vrot.lane.b32.xlu2 %v2271_v15, %s2088_s21  ;;  %1701 = vrot.lane.b32.xlu0 %v2295_v35, %s2084_s1 }
 0x1a8   :  { %v2348_v39 = vpop.permute.xlu0 %1486  ;;  %431 = vmatpush.msra.mxu2 %v237_v50 }
 0x1aa   :  { %432 = vmatpush.msra.mxu2 %v230_v46  ;;  %v1498_v46 = vunpack.i.l.bf16 %v1497_v24 }
 0x1ac   :  { %433 = vmatpush.msra.mxu2 %v2254_v1 }
 0x1ae   :  { %434 = vmatpush.msra.mxu2 %v2286_v32  ;;  %1661 = vrot.lane.b32.xlu1 %v2247_v60, %s2088_s21 }
 0x1af   :  { %1666 = vrot.lane.b32.xlu2 %v2292_v34, %s2088_s21  ;;  %1716 = vrot.lane.b32.xlu0 %v1610_v52, %s2084_s1 }
 0x1b0   :  { %v2357_v36 = vpop.permute.xlu0 %1501  ;;  %435 = vmatpush.msra.mxu2 %v2289_v33 }
 0x1b1   :  { %v1503_v63 = vunpack.i.l.bf16 %v2357_v36 }
 0x1b2   :  { %436 = vmatpush.msra.mxu2 %v2244_v59 }
 0x1b4   :  { %437 = vmatpush.msra.mxu2 %v2262_v12  ;;  %v1542_v12 = vpop.permute.xlu2 %1541 }
 0x1b5   :  { %v1544_v19 = vunpack.i.h.bf16 %v1542_v12  ;;  %v1543_v21 = vunpack.i.l.bf16 %v1542_v12 }
 0x1b6   :  { %438 = vmatpush.msra.mxu2 %v2265_v13  ;;  %1676 = vrot.lane.b32.xlu1 %v2237_v54, %s2084_s1 }
 0x1b7   :  { %1681 = vrot.lane.b32.xlu2 %v2271_v15, %s2084_s1  ;;  %1731 = vrot.lane.b32.xlu0 %v1625_v7, %s2084_s1  ;;  %v1528_v7 = vunpack.i.l.bf16 %v1527_v41  ;;  %v2465_v24 = vsel %vm257_vm11, %v1543_v21, %v1544_v19 }
 0x1b8   :  { %v1517_v1 = vpop.permute.xlu0 %1516  ;;  %439 = vmatpush.msra.mxu2 %v2234_v53  ;;  %v2381_v53 = vpop.permute.xlu1 %1491  ;;  %v2468_v30 = vpack.i.bf16 %v1544_v19, %v2465_v24 }
 0x1b9   :  { %v1519_v32 = vunpack.i.h.bf16 %v1517_v1  ;;  %v1518_v33 = vunpack.i.l.bf16 %v1517_v1 }
 0x1ba   :  { %440 = vmatpush.msra.mxu2 %v2200_v40 }
 0x1bb   :  { %v2371_v59 = vsel %vm222_vm14, %v1518_v33, %v1519_v32  ;;  %vm345_vm14 = vcmask 916480   ;;  %441 = vmatmul.f32.vlgmr.msra.gmra.mxu2 %v2592_v29 }
 0x1bc   :  { %v2374_v13 = vpack.i.bf16 %v1519_v32, %v2371_v59  ;;  %v2385_v40 = vpop.permute.xlu2 %1556  ;;  %v2426_v0 = vsel %vm345_vm14, %v1478_v58, %v1479_v57 }
 0x1bd   :  { %v1750_v5 = vpack.i.bf16 %v1479_v57, %v2426_v0  ;;  %v1558_v1 = vunpack.i.l.bf16 %v2385_v40 }
 0x1be   :  { %1691 = vrot.lane.b32.xlu1 %v2247_v60, %s2084_s1 }
 0x1bf   :  { %1696 = vrot.lane.b32.xlu2 %v2292_v34, %s2084_s1  ;;  %1746 = vrot.lane.b32.xlu0 %v1640_v23, %s2084_s1 }
 0x1c0   :  { %v2383_v42 = vpop.permute.xlu0 %1531  ;;  %v2395_v44 = vpop.permute.xlu1 %1506 }
 0x1c1   :  { %v1509_v57 = vunpack.i.h.bf16 %v2395_v44  ;;  %v1508_v58 = vunpack.i.l.bf16 %v2395_v44  ;;  %v1533_v28 = vunpack.i.l.bf16 %v2383_v42 }
 0x1c4   :  { %v2403_v50 = vpop.permute.xlu2 %1566 }
 0x1c5   :  { %3125 = vst [vmem:[#allocation18_spill] sm:$0xff] %v2403_v50 }
 0x1c6   :  { %1706 = vrot.lane.b32.xlu1 %v2257_v2, %s2084_s1 }
 0x1c7   :  { %1711 = vrot.lane.b32.xlu2 %v2308_v51, %s2084_s1  ;;  %1766 = vrot.lane.b32.xlu0 %v2274_v16, %s2085_s18  ;;  %v2408_v16 = vsel %vm194_vm15, %v1498_v46, %v1499_v45  ;;  %vm685_vm15 = vcmask 588800  }
 0x1c8   :  { %v2393_v43 = vpop.permute.xlu0 %1546  ;;  %v2410_v56 = vpop.permute.xlu1 %1521 }
 0x1ce   :  { %1721 = vrot.lane.b32.xlu1 %v2277_v17, %s2084_s1  ;;  %v2415_v17 = vpack.i.bf16 %v1499_v45, %v2408_v16  ;;  %v1488_v45 = vunpack.i.l.bf16 %v2348_v39 }
 0x1cf   :  { %1726 = vrot.lane.b32.xlu2 %v2319_v6, %s2084_s1  ;;  %1781 = vrot.lane.b32.xlu0 %v2295_v35, %s2085_s18  ;;  %v1529_v6 = vunpack.i.h.bf16 %v1527_v41  ;;  %v1494_v41 = vunpack.i.h.bf16 %v2381_v53 }
 0x1d0   :  { %v2405_v52 = vpop.permute.xlu0 %1561  ;;  %v2437_v8 = vpop.permute.xlu1 %1536 }
 0x1d1   :  { %v2449_v11 = vsel %vm236_vm7, %v1528_v7, %v1529_v6  ;;  %v2518_v7 = vsel %vm208_vm4, %v1508_v58, %v1509_v57 }
 0x1d2   :  { %v2452_v18 = vpack.i.bf16 %v1529_v6, %v2449_v11 }
 0x1d6   :  { %1736 = vrot.lane.b32.xlu1 %v2298_v37, %s2084_s1  ;;  %v2435_v37 = vpack.i.bf16 %v1514_v62, %v2431_v4  ;;  %v1504_v62 = vunpack.i.h.bf16 %v2357_v36 }
 0x1d7   :  { %1741 = vrot.lane.b32.xlu2 %v2331_v22, %s2084_s1  ;;  %1806 = vrot.lane.b32.xlu0 %v2415_v17, %s2089_s22 }
 0x1d8   :  { %v2423_v35 = vpop.permute.xlu2 %1581  ;;  %v2521_v36 = vsel %vm201_vm13, %v1503_v63, %v1504_v62  ;;  %vm421_vm13 = vcmask 457728  }
 0x1d9   :  { %v2428_v3 = vpop.permute.xlu0 %1571 }
 0x1de   :  { %1751 = vrot.lane.b32.xlu1 %v1750_v5, %s2084_s1 }
 0x1df   :  { %1761 = vrot.lane.b32.xlu2 %v2271_v15, %s2085_s18  ;;  %1821 = vrot.lane.b32.xlu0 %v2435_v37, %s2089_s22  ;;  %v1552_v15 = vpop.permute.xlu1 %1551 }
 0x1e0   :  { %v2444_v9 = vpop.permute.xlu2 %1596  ;;  %v1554_v58 = vunpack.i.h.bf16 %v1552_v15  ;;  %v1553_v63 = vunpack.i.l.bf16 %v1552_v15 }
 0x1e1   :  { %v2446_v10 = vpop.permute.xlu0 %1586 }
 0x1e6   :  { %1756 = vrot.lane.b32.xlu1 %v2237_v54, %s2085_s18  ;;  %v1493_v54 = vunpack.i.l.bf16 %v2381_v53 }
 0x1e7   :  { %1776 = vrot.lane.b32.xlu2 %v2292_v34, %s2085_s18  ;;  %1836 = vrot.lane.b32.xlu0 %v2452_v18, %s2089_s22  ;;  %v1559_v34 = vunpack.i.h.bf16 %v2385_v40 }
 0x1e8   :  { %v2460_v22 = vpop.permute.xlu2 %1611  ;;  %v2487_v53 = vsel %vm167_vm10, %v1493_v54, %v1494_v41  ;;  %v2528_v54 = vpack.i.bf16 %v1509_v57, %v2518_v7 }
 0x1e9   :  { %v2462_v23 = vpop.permute.xlu0 %1601  ;;  %v2490_v40 = vsel %vm278_vm12, %v1558_v1, %v1559_v34  ;;  %v1524_v1 = vunpack.i.h.bf16 %v2410_v56 }
 0x1ea   :  { %v2498_v46 = vpack.i.bf16 %v1559_v34, %v2490_v40  ;;  %v2531_v34 = vpack.i.bf16 %v1504_v62, %v2521_v36  ;;  %v1603_v14 = vunpack.i.l.bf16 %v2462_v23 }
 0x1ee   :  { %1771 = vrot.lane.b32.xlu1 %v2247_v60, %s2085_s18  ;;  %v1489_v60 = vunpack.i.h.bf16 %v2348_v39 }
 0x1ef   :  { %1791 = vrot.lane.b32.xlu2 %v2308_v51, %s2085_s18  ;;  %1851 = vrot.lane.b32.xlu0 %v2468_v30, %s2089_s22  ;;  %v2495_v51 = vpack.i.bf16 %v1494_v41, %v2487_v53 }
 0x1f0   :  { %v2480_v32 = vpop.permute.xlu1 %1576  ;;  %v2482_v33 = vpop.permute.xlu2 %1626  ;;  %v2513_v5 = vsel %vm154_vm9, %v1488_v45, %v1489_v60  ;;  %v1523_v45 = vunpack.i.l.bf16 %v2410_v56  ;;  %v2551_v56 = vsel %vm271_vm1, %v1553_v63, %v1554_v58  ;;  %vm406_vm1 = vcmask 785408  }
 0x1f1   :  { %v2484_v12 = vpop.permute.xlu0 %1616  ;;  %v2525_v41 = vpack.i.bf16 %v1489_v60, %v2513_v5 }
 0x1f3   :  { %3126 = vst [vmem:[#allocation19_spill] sm:$0xff] %v2525_v41 }
 0x1f6   :  { %1786 = vrot.lane.b32.xlu1 %v2257_v2, %s2085_s18 }
 0x1f7   :  { %1801 = vrot.lane.b32.xlu2 %v2495_v51, %s2089_s22  ;;  %1866 = vrot.lane.b32.xlu0 %v2498_v46, %s2089_s22 }
 0x1f8   :  { %v2510_v39 = vpop.permute.xlu1 %1591 }
 0x1f9   :  { %v1642_v6 = vpop.permute.xlu2 %1641  ;;  %v2515_v44 = vpop.permute.xlu0 %1631 }
 0x1fa   :  { %v1644_v2 = vunpack.i.h.bf16 %v1642_v6  ;;  %v1643_v19 = vunpack.i.l.bf16 %v1642_v6  ;;  %v2548_v6 = vsel %vm229_vm6, %v1523_v45, %v1524_v1 }
 0x1fb   :  { %v2554_v15 = vpack.i.bf16 %v1524_v1, %v2548_v6 }
 0x1fc   :  { %v361_v21 = vsel %vm345_vm14, %v1643_v19, %v1644_v2  ;;  %v2557_v2 = vpack.i.bf16 %v1554_v58, %v2551_v56  ;;  %v1539_v19 = vunpack.i.h.bf16 %v2437_v8 }
 0x1fd   :  { %445 = vmatpush.msra.mxu3 %v361_v21  ;;  %v1538_v21 = vunpack.i.l.bf16 %v2437_v8  ;;  %v1534_v8 = vunpack.i.h.bf16 %v2383_v42 }
 0x1fe   :  { %1796 = vrot.lane.b32.xlu1 %v2525_v41, %s2089_s22 }
 0x1ff   :  { %1816 = vrot.lane.b32.xlu2 %v2528_v54, %s2089_s22  ;;  %1881 = vrot.lane.b32.xlu0 %v2531_v34, %s2088_s21  ;;  %v2568_v58 = vsel %vm250_vm8, %v1538_v21, %v1539_v19 }
 0x200   :  { %v2541_v60 = vpop.permute.xlu1 %1606  ;;  %v1845_v20 = vpack.i.bf16 %v1539_v19, %v2568_v58 }
 0x201   :  { %v2543_v57 = vpop.permute.xlu2 %1651  ;;  %v2545_v62 = vpop.permute.xlu0 %1656 }
 0x206   :  { %1811 = vrot.lane.b32.xlu1 %v2531_v34, %s2089_s22 }
 0x207   :  { %1831 = vrot.lane.b32.xlu2 %v2554_v15, %s2089_s22  ;;  %1896 = vrot.lane.b32.xlu0 %v2557_v2, %s2084_s1 }
 0x208   :  { %v1622_v45 = vpop.permute.xlu1 %1621 }
 0x209   :  { %v1667_v63 = vpop.permute.xlu2 %1666  ;;  %v1672_v1 = vpop.permute.xlu0 %1671  ;;  %v1624_v50 = vunpack.i.h.bf16 %v1622_v45 }
 0x20a   :  { %v1674_v55 = vunpack.i.h.bf16 %v1672_v1  ;;  %v1673_v25 = vunpack.i.l.bf16 %v1672_v1  ;;  %v1669_v31 = vunpack.i.h.bf16 %v1667_v63  ;;  %v1668_v47 = vunpack.i.l.bf16 %v1667_v63 }
 0x20b   :  { %v2581_v63 = vsel %vm243_vm2, %v1533_v28, %v1534_v8  ;;  %v1629_v28 = vunpack.i.h.bf16 %v2482_v33 }
 0x20c   :  { %v413_v49 = vsel %vm406_vm1, %v1673_v25, %v1674_v55  ;;  %v412_v21 = vsel %vm406_vm1, %v1668_v47, %v1669_v31  ;;  %v1634_v25 = vunpack.i.h.bf16 %v2515_v44  ;;  %v1628_v31 = vunpack.i.l.bf16 %v2482_v33 }
 0x20d   :  { %474 = vmatpush.msrb.mxu0 %v413_v49  ;;  %v1633_v49 = vunpack.i.l.bf16 %v2515_v44  ;;  %v1549_v44 = vunpack.i.h.bf16 %v2393_v43  ;;  %v1619_v33 = vunpack.i.h.bf16 %v2484_v12 }
 0x20e   :  { %1826 = vrot.lane.b32.xlu1 %v2374_v13, %s2089_s22 }
 0x20f   :  { %1846 = vrot.lane.b32.xlu2 %v1845_v20, %s2089_s22  ;;  %1911 = vrot.lane.b32.xlu0 %v2525_v41, %s2088_s21  ;;  %v1623_v41 = vunpack.i.l.bf16 %v1622_v45  ;;  %v359_v38 = vsel %vm345_vm14, %v1633_v49, %v1634_v25  ;;  %v1614_v25 = vunpack.i.h.bf16 %v2460_v22 }
 0x210   :  { %475 = vmatpush.msrb.mxu0 %v412_v21  ;;  %v1637_v42 = vpop.permute.xlu1 %1636  ;;  %v1548_v21 = vunpack.i.l.bf16 %v2393_v43  ;;  %v358_v43 = vsel %vm345_vm14, %v1628_v31, %v1629_v28  ;;  %v1608_v28 = vunpack.i.l.bf16 %v2541_v60 }
 0x211   :  { %v1639_v55 = vunpack.i.h.bf16 %v1637_v42  ;;  %v1638_v19 = vunpack.i.l.bf16 %v1637_v42  ;;  %v2585_v1 = vpop.permute.xlu2 %1681  ;;  %v2587_v26 = vpop.permute.xlu0 %1686  ;;  %v2601_v42 = vpack.i.bf16 %v1534_v8, %v2581_v63 }
 0x212   :  { %v2615_v45 = vsel %vm264_vm5, %v1548_v21, %v1549_v44  ;;  %v1564_v21 = vunpack.i.h.bf16 %v2405_v52 }
 0x213   :  { %v360_v47 = vsel %vm345_vm14, %v1638_v19, %v1639_v55  ;;  %v1618_v55 = vunpack.i.l.bf16 %v2484_v12  ;;  %v357_v19 = vsel %vm345_vm14, %v1623_v41, %v1624_v50  ;;  %v1599_v41 = vunpack.i.h.bf16 %v2444_v9 }
 0x214   :  { %446 = vmatpush.msra.mxu3 %v360_v47  ;;  %v2628_v47 = vpack.i.bf16 %v1549_v44, %v2615_v45 }
 0x215   :  { %v356_v31 = vsel %vm345_vm14, %v1618_v55, %v1619_v33  ;;  %v1594_v55 = vunpack.i.h.bf16 %v2510_v39 }
 0x216   :  { %1841 = vrot.lane.b32.xlu1 %v2601_v42, %s2089_s22  ;;  %447 = vmatpush.msra.mxu3 %v359_v38  ;;  %v1613_v38 = vunpack.i.l.bf16 %v2460_v22  ;;  %v1563_v22 = vunpack.i.l.bf16 %v2405_v52 }
 0x217   :  { %1861 = vrot.lane.b32.xlu2 %v2435_v37, %s2088_s21  ;;  %1921 = vrot.lane.b32.xlu0 %v1845_v20, %s2084_s1  ;;  %v1609_v20 = vunpack.i.h.bf16 %v2541_v60  ;;  %v1598_v60 = vunpack.i.l.bf16 %v2444_v9 }
 0x218   :  { %v2612_v8 = vpop.permute.xlu1 %1646  ;;  %448 = vmatpush.msra.mxu3 %v358_v43  ;;  %v1604_v43 = vunpack.i.h.bf16 %v2462_v23  ;;  %v355_v50 = vsel %vm345_vm14, %v1613_v38, %v1614_v25  ;;  %v2645_v23 = vsel %vm345_vm14, %v1563_v22, %v1564_v21  ;;  %v1593_v25 = vunpack.i.l.bf16 %v2510_v39 }
 0x219   :  { %v2619_v49 = vpop.permute.xlu2 %1696  ;;  %v2621_v12 = vpop.permute.xlu0 %1701  ;;  %v354_v52 = vsel %vm345_vm14, %v1608_v28, %v1609_v20  ;;  %v1588_v20 = vunpack.i.l.bf16 %v2446_v10  ;;  %v1659_v28 = vunpack.i.h.bf16 %v2545_v62  ;;  %v1975_v39 = vpack.i.bf16 %v1564_v21, %v2645_v23 }
 0x21a   :  { %449 = vmatpush.msra.mxu3 %v357_v19  ;;  %v353_v33 = vsel %vm345_vm14, %v1603_v14, %v1604_v43  ;;  %v352_v14 = vsel %vm345_vm14, %v1598_v60, %v1599_v41  ;;  %v1584_v43 = vunpack.i.h.bf16 %v2423_v35  ;;  %v1578_v41 = vunpack.i.l.bf16 %v2480_v32 }
 0x21b   :  { %v1649_v21 = vunpack.i.h.bf16 %v2612_v8  ;;  %v1648_v60 = vunpack.i.l.bf16 %v2612_v8 }
 0x21c   :  { %450 = vmatpush.msra.mxu3 %v356_v31  ;;  %v1658_v31 = vunpack.i.l.bf16 %v2545_v62  ;;  %v1579_v62 = vunpack.i.h.bf16 %v2480_v32  ;;  %v1484_v32 = vunpack.i.h.bf16 %v2339_v27 }
 0x21e   :  { %1856 = vrot.lane.b32.xlu1 %v2628_v47, %s2089_s22  ;;  %451 = vmatpush.msra.mxu3 %v355_v50  ;;  %v1583_v50 = vunpack.i.l.bf16 %v2423_v35  ;;  %v410_v35 = vsel %vm406_vm1, %v1658_v31, %v1659_v28  ;;  %v1573_v28 = vunpack.i.l.bf16 %v2428_v3  ;;  %v408_v31 = vsel %vm406_vm1, %v1648_v60, %v1649_v21 }
 0x21f   :  { %1876 = vrot.lane.b32.xlu2 %v2557_v2, %s2089_s22  ;;  %1936 = vrot.lane.b32.xlu0 %v2452_v18, %s2084_s1  ;;  %v1589_v18 = vunpack.i.h.bf16 %v2446_v10  ;;  %v1653_v10 = vunpack.i.l.bf16 %v2543_v57 }
 0x220   :  { %v1662_v44 = vpop.permute.xlu1 %1661  ;;  %452 = vmatpush.msra.mxu3 %v354_v52  ;;  %v1654_v52 = vunpack.i.h.bf16 %v2543_v57 }
 0x221   :  { %v2650_v9 = vpop.permute.xlu2 %1711  ;;  %v1664_v38 = vunpack.i.h.bf16 %v1662_v44  ;;  %v1663_v2 = vunpack.i.l.bf16 %v1662_v44  ;;  %v2652_v19 = vpop.permute.xlu0 %1716  ;;  %v351_v44 = vsel %vm345_vm14, %v1593_v25, %v1594_v55  ;;  %v350_v57 = vsel %vm345_vm14, %v1588_v20, %v1589_v18 }
 0x222   :  { %453 = vmatpush.msra.mxu3 %v353_v33  ;;  %v1483_v55 = vunpack.i.l.bf16 %v2339_v27  ;;  %v348_v18 = vsel %vm345_vm14, %v1578_v41, %v1579_v62  ;;  %v1574_v20 = vunpack.i.h.bf16 %v2428_v3  ;;  %v1718_v3 = vunpack.i.l.bf16 %v2652_v19 }
 0x223   :  { %v411_v22 = vsel %vm406_vm1, %v1663_v2, %v1664_v38  ;;  %v409_v38 = vsel %vm406_vm1, %v1653_v10, %v1654_v52  ;;  %v349_v2 = vsel %vm345_vm14, %v1583_v50, %v1584_v43  ;;  %v1990_v27 = vpack.i.bf16 %v1579_v62, %v348_v18  ;;  %v2710_v50 = vld [vmem:[%s3093_s2 + $0x8] sm:$0xff] }
 0x224   :  { %454 = vmatpush.msra.mxu3 %v352_v14  ;;  %476 = vmatpush.msrb.mxu0 %v411_v22  ;;  %v407_v14 = vsel %vm406_vm1, %v1483_v55, %v1484_v32  ;;  %v2695_v22 = vld [vmem:[%s3093_s2 + $0x10] sm:$0xff] }
 0x226   :  { %1871 = vrot.lane.b32.xlu1 %v2528_v54, %s2088_s21  ;;  %455 = vmatpush.msra.mxu3 %v351_v44 }
 0x227   :  { %1891 = vrot.lane.b32.xlu2 %v2415_v17, %s2088_s21  ;;  %1976 = vrot.lane.b32.xlu0 %v1975_v39, %s2084_s1  ;;  %v347_v39 = vsel %vm345_vm14, %v1573_v28, %v1574_v20 }
 0x228   :  { %477 = vmatpush.msrb.mxu0 %v410_v35  ;;  %v2677_v33 = vpop.permute.xlu1 %1676  ;;  %456 = vmatpush.msra.mxu3 %v350_v57 }
 0x229   :  { %v2681_v25 = vpop.permute.xlu2 %1726  ;;  %v2683_v8 = vpop.permute.xlu0 %1731 }
 0x22a   :  { %478 = vmatpush.msrb.mxu0 %v409_v38  ;;  %457 = vmatpush.msra.mxu3 %v349_v2  ;;  %v1734_v32 = vunpack.i.h.bf16 %v2683_v8  ;;  %v1729_v55 = vunpack.i.h.bf16 %v2681_v25  ;;  %v1728_v38 = vunpack.i.l.bf16 %v2681_v25  ;;  %v2040_v2 = vld [vmem:[#allocation3 + $0x8] sm:$0xff] }
 0x22c   :  { %479 = vmatpush.msrb.mxu0 %v408_v31  ;;  %458 = vmatpush.msra.mxu3 %v348_v18 }
 0x22e   :  { %480 = vmatpush.msrb.mxu0 %v407_v14  ;;  %1886 = vrot.lane.b32.xlu1 %v2498_v46, %s2084_s1  ;;  %v1713_v14 = vunpack.i.l.bf16 %v2650_v9 }
 0x22f   :  { %1906 = vrot.lane.b32.xlu2 %v2628_v47, %s2084_s1  ;;  %1991 = vrot.lane.b32.xlu0 %v1990_v27, %s2084_s1 }
 0x230   :  { %459 = vmatpush.msra.mxu3 %v347_v39  ;;  %v2705_v43 = vpop.permute.xlu1 %1691  ;;  %1362 = vmatmul.msk.f32.vlgmr.msrb.gmra.mxu0 %vm421_vm13, %v2695_v22 }
 0x231   :  { %v1742_v46 = vpop.permute.xlu2 %1741  ;;  %v1747_v52 = vpop.permute.xlu0 %1746 }
 0x232   :  { %v1749_v47 = vunpack.i.h.bf16 %v1747_v52  ;;  %v1748_v10 = vunpack.i.l.bf16 %v1747_v52  ;;  %460 = vmatpush.msra.mxu3 %v2426_v0  ;;  %v1744_v44 = vunpack.i.h.bf16 %v1742_v46  ;;  %v1743_v62 = vunpack.i.l.bf16 %v1742_v46 }
 0x233   :  { %461 = vmatmul.f32.vlgmr.msra.gmra.mxu3 %v2710_v50 }
 0x234   :  { %1023 = vmatpush.msrb.mxu3 %v2490_v40  ;;  %v571_v41 = vsel %vm243_vm2, %v1748_v10, %v1749_v47  ;;  %v570_v0 = vsel %vm243_vm2, %v1743_v62, %v1744_v44  ;;  %v1704_v62 = vunpack.i.h.bf16 %v2621_v12 }
 0x235   :  { %597 = vmatpush.msrb.mxu1 %v571_v41  ;;  %v1703_v41 = vunpack.i.l.bf16 %v2621_v12  ;;  %v41_v12 = vld [vmem:[%s3096_s5] sm:$0xff] }
 0x236   :  { %1024 = vmatpush.msrb.mxu3 %v2551_v56  ;;  %1901 = vrot.lane.b32.xlu1 %v2495_v51, %s2088_s21 }
 0x237   :  { %1931 = vrot.lane.b32.xlu2 %v2554_v15, %s2085_s18  ;;  %1996 = vrot.lane.b32.xlu0 %v2415_v17, %s2085_s18 }
 0x238   :  { %1025 = vmatpush.msrb.mxu3 %v2615_v45  ;;  %598 = vmatpush.msrb.mxu1 %v570_v0  ;;  %v2727_v21 = vpop.permute.xlu1 %1706  ;;  %v1699_v0 = vunpack.i.h.bf16 %v2619_v49 }
 0x239   :  { %v2729_v60 = vpop.permute.xlu2 %1761  ;;  %v2731_v35 = vpop.permute.xlu0 %1766  ;;  %v1708_v47 = vunpack.i.l.bf16 %v2727_v21 }
 0x23a   :  { %1026 = vmatpush.msrb.mxu3 %v2465_v24  ;;  %v153_v24 = vrot.slane %v2227_v48, 4 }
 0x23c   :  { %1027 = vmatpush.msrb.mxu3 %v2568_v58 }
 0x23e   :  { %1028 = vmatpush.msrb.mxu3 %v2581_v63  ;;  %1916 = vrot.lane.b32.xlu1 %v2468_v30, %s2084_s1 }
 0x23f   :  { %1946 = vrot.lane.b32.xlu2 %v2554_v15, %s2084_s1 }
 0x240   :  { %1029 = vmatpush.msrb.mxu3 %v2449_v11  ;;  %v1722_v56 = vpop.permute.xlu1 %1721 }
 0x241   :  { %v2741_v45 = vpop.permute.xlu2 %1776  ;;  %v2743_v57 = vpop.permute.xlu0 %1781  ;;  %v1723_v31 = vunpack.i.l.bf16 %v1722_v56 }
 0x242   :  { %1030 = vmatpush.msrb.mxu3 %v2548_v6 }
 0x244   :  { %1031 = vmatpush.msrb.mxu3 %v2371_v59  ;;  %v156_v59 = vsel %vm154_vm9, %v2227_v48, %v153_v24  ;;  %v1965_v48 = vpack.i.bf16 %v1574_v20, %v347_v39  ;;  %v2041_v39 = vld [vmem:[#allocation2 + $0x10] sm:$0xff]  ;;  %vm3127_vm9 = vcmask 31744  }
 0x245   :  { %v160_v18 = vmax.f32 %v2040_v2, %v156_v59  ;;  %v562_v59 = vsel %vm243_vm2, %v1703_v41, %v1704_v62 }
 0x246   :  { %1032 = vmatpush.msrb.mxu3 %v2431_v4  ;;  %1926 = vrot.lane.b32.xlu1 %v2601_v42, %s2084_s1  ;;  %v166_v4 = vrot.slane %v2251_v61, 4  ;;  %v1733_v42 = vunpack.i.l.bf16 %v2683_v8  ;;  %v1724_v8 = vunpack.i.h.bf16 %v1722_v56 }
 0x247   :  { %1956 = vrot.lane.b32.xlu2 %v2374_v13, %s2084_s1 }
 0x248   :  { %1033 = vmatpush.msrb.mxu3 %v2518_v7  ;;  %v1737_v11 = vpop.permute.xlu1 %1736  ;;  %v169_v28 = vsel %vm167_vm10, %v2251_v61, %v166_v4  ;;  %v567_v61 = vsel %vm243_vm2, %v1728_v38, %v1729_v55  ;;  %v1688_v4 = vunpack.i.l.bf16 %v2587_v26  ;;  %v1679_v55 = vunpack.i.h.bf16 %v2677_v33  ;;  %vm3130_vm10 = vmmov %vm3127_vm9 }
 0x249   :  { %v2754_v30 = vpop.permute.xlu2 %1791  ;;  %v1739_v15 = vunpack.i.h.bf16 %v1737_v11  ;;  %v1738_v58 = vunpack.i.l.bf16 %v1737_v11  ;;  %v2756_v6 = vpop.permute.xlu0 %1806  ;;  %v173_v20 = vmax.f32 %v160_v18, %v169_v28  ;;  %v1678_v38 = vunpack.i.l.bf16 %v2677_v33  ;;  %v2845_v33 = vld [vmem:[%s3094_s3] sm:$0xff] }
 0x24a   :  { %1034 = vmatpush.msrb.mxu3 %v2521_v36  ;;  %v568_v36 = vsel %vm243_vm2, %v1733_v42, %v1734_v32  ;;  %v1684_v42 = vunpack.i.h.bf16 %v2585_v1 }
 0x24b   :  { %v569_v7 = vsel %vm243_vm2, %v1738_v58, %v1739_v15  ;;  %v1694_v58 = vunpack.i.h.bf16 %v2705_v43  ;;  %v557_v28 = vsel %vm243_vm2, %v1678_v38, %v1679_v55 }
 0x24c   :  { %1035 = vmatpush.msrb.mxu3 %v2408_v16  ;;  %599 = vmatpush.msrb.mxu1 %v569_v7  ;;  %v1719_v16 = vunpack.i.h.bf16 %v2652_v19  ;;  %v566_v19 = vsel %vm243_vm2, %v1723_v31, %v1724_v8  ;;  %v1683_v7 = vunpack.i.l.bf16 %v2585_v1  ;;  %v3129_v31 = vld [vmem:[#allocation12_spill] sm:$0xff] }
 0x24e   :  { %1036 = vmatpush.msrb.mxu3 %v2487_v53  ;;  %1941 = vrot.lane.b32.xlu1 %v2374_v13, %s2085_s18  ;;  %v1714_v53 = vunpack.i.h.bf16 %v2650_v9  ;;  %v565_v9 = vsel %vm243_vm2, %v1718_v3, %v1719_v16 }
 0x24f   :  { %600 = vmatpush.msrb.mxu1 %v568_v36  ;;  %1966 = vrot.lane.b32.xlu2 %v1965_v48, %s2084_s1  ;;  %v558_v48 = vsel %vm243_vm2, %v1683_v7, %v1684_v42 }
 0x250   :  { %1037 = vmatpush.msrb.mxu3 %v2513_v5  ;;  %v2780_v25 = vpop.permute.xlu1 %1751  ;;  %v1709_v5 = vunpack.i.h.bf16 %v2727_v21  ;;  %v1698_v21 = vunpack.i.l.bf16 %v2619_v49  ;;  %v1693_v49 = vunpack.i.l.bf16 %v2705_v43 }
 0x251   :  { %v1802_v27 = vpop.permute.xlu2 %1801  ;;  %v2784_v13 = vpop.permute.xlu0 %1821  ;;  %601 = vmatpush.msrb.mxu1 %v567_v61 }
 0x252   :  { %1038 = vmatpush.msrb.mxu3 %v2041_v39  ;;  %v1804_v46 = vunpack.i.h.bf16 %v1802_v27  ;;  %v1803_v52 = vunpack.i.l.bf16 %v1802_v27  ;;  %v563_v24 = vsel %vm243_vm2, %v1708_v47, %v1709_v5  ;;  %v561_v32 = vsel %vm243_vm2, %v1698_v21, %v1699_v0 }
 0x253   :  { %1039 = vmatmul.f32.vlgmr.msrb.gmra.mxu3 %v2592_v29  ;;  %602 = vmatpush.msrb.mxu1 %v566_v19  ;;  %v564_v29 = vsel %vm243_vm2, %v1713_v14, %v1714_v53  ;;  %v560_v43 = vsel %vm243_vm2, %v1693_v49, %v1694_v58 }
 0x254   :  { %v2792_v10 = vsel %vm345_vm14, %v1803_v52, %v1804_v46  ;;  %1370 = vmatpush.msk.msra.mxu3 %vm35_vm0, %v173_v20 }
 0x255   :  { %v2010_v44 = vpack.i.bf16 %v1804_v46, %v2792_v10  ;;  %603 = vmatpush.msrb.mxu1 %v565_v9 }
 0x256   :  { %1951 = vrot.lane.b32.xlu1 %v2435_v37, %s2085_s18 }
 0x257   :  { %2011 = vrot.lane.b32.xlu0 %v2010_v44, %s2084_s1  ;;  %604 = vmatpush.msrb.mxu1 %v564_v29 }
 0x258   :  { %1971 = vrot.lane.b32.xlu2 %v2435_v37, %s2084_s1  ;;  %v2807_v56 = vpop.permute.xlu1 %1756  ;;  %v1689_v37 = vunpack.i.h.bf16 %v2587_v26 }
 0x259   :  { %v2813_v11 = vpop.permute.xlu2 %1816  ;;  %v2815_v15 = vpop.permute.xlu0 %1836  ;;  %605 = vmatpush.msrb.mxu1 %v563_v24 }
 0x25a   :  { %v559_v2 = vsel %vm243_vm2, %v1688_v4, %v1689_v37 }
 0x25b   :  { %1371 = vmatmul.msk.f32.vlgmr.msra.gmra.mxu3 %vm3127_vm9, %v41_v12  ;;  %606 = vmatpush.msrb.mxu1 %v562_v59 }
 0x25d   :  { %607 = vmatpush.msrb.mxu1 %v561_v32 }
 0x25e   :  { %1961 = vrot.lane.b32.xlu1 %v2528_v54, %s2085_s18 }
 0x25f   :  { %608 = vmatpush.msrb.mxu1 %v560_v43 }
 0x260   :  { %1986 = vrot.lane.b32.xlu2 %v2528_v54, %s2084_s1  ;;  %v2833_v26 = vpop.permute.xlu1 %1771  ;;  %v3128_v54 = vld [vmem:[#allocation16_spill] sm:$0xff] }
 0x261   :  { %v2836_v18 = vpop.permute.xlu2 %1831  ;;  %v2838_v1 = vpop.permute.xlu0 %1851  ;;  %609 = vmatpush.msrb.mxu1 %v559_v2 }
 0x262   :  { %v1854_v4 = vunpack.i.h.bf16 %v2838_v1  ;;  %v1853_v32 = vunpack.i.l.bf16 %v2838_v1 }
 0x263   :  { %610 = vmatpush.msrb.mxu1 %v558_v48 }
 0x265   :  { %611 = vmatpush.msrb.mxu1 %v557_v28 }
 0x266   :  { %1981 = vrot.lane.b32.xlu1 %v2531_v34, %s2085_s18 }
 0x267   :  { %612 = vmatpush.msrb.mxu1 %v3128_v54  ;;  %v961_v54 = vsel %vm345_vm14, %v1853_v32, %v1854_v4 }
 0x268   :  { %2006 = vrot.lane.b32.xlu2 %v2495_v51, %s2085_s18  ;;  %613 = vmatmul.f32.vlgmr.msrb.gmra.mxu1 %v2845_v33  ;;  %v2853_v8 = vpop.permute.xlu1 %1786 }
 0x269   :  { %1365 = vmatpush.msk.msra.mxu1 %vm35_vm0, %v3129_v31  ;;  %v1847_v36 = vpop.permute.xlu2 %1846  ;;  %v1867_v16 = vpop.permute.xlu0 %1866  ;;  %v1839_v31 = vunpack.i.h.bf16 %v2815_v15  ;;  %vm593_vm0 = vcmask 195584  }
 0x26a   :  { %v1869_v3 = vunpack.i.h.bf16 %v1867_v16  ;;  %v1868_v61 = vunpack.i.l.bf16 %v1867_v16  ;;  %v1849_v55 = vunpack.i.h.bf16 %v1847_v36  ;;  %v1848_v38 = vunpack.i.l.bf16 %v1847_v36 }
 0x26b   :  { %v1838_v16 = vunpack.i.l.bf16 %v2815_v15 }
 0x26c   :  { %v964_v20 = vsel %vm345_vm14, %v1868_v61, %v1869_v3  ;;  %v960_v1 = vsel %vm345_vm14, %v1848_v38, %v1849_v55  ;;  %v1834_v3 = vunpack.i.h.bf16 %v2836_v18  ;;  %v1833_v61 = vunpack.i.l.bf16 %v2836_v18 }
 0x26d   :  { %1043 = vmatpush.msrb.mxu1 %v964_v20 }
 0x26e   :  { %2001 = vrot.lane.b32.xlu1 %v2531_v34, %s2084_s1 }
 0x270   :  { %2031 = vrot.lane.b32.xlu2 %v2495_v51, %s2084_s1  ;;  %1366 = vmatmul.msk.f32.vlgmr.msra.gmra.mxu1 %vm3130_vm10, %v41_v12  ;;  %v1797_v53 = vpop.permute.xlu1 %1796  ;;  %v3131_v51 = vld [vmem:[#allocation19_spill] sm:$0xff] }
 0x271   :  { %v1862_v27 = vpop.permute.xlu2 %1861  ;;  %v1799_v14 = vunpack.i.h.bf16 %v1797_v53  ;;  %v1798_v39 = vunpack.i.l.bf16 %v1797_v53  ;;  %v2863_v46 = vpop.permute.xlu0 %1881 }
 0x272   :  { %v1864_v52 = vunpack.i.h.bf16 %v1862_v27  ;;  %v1863_v19 = vunpack.i.l.bf16 %v1862_v27  ;;  %v1884_v36 = vunpack.i.h.bf16 %v2863_v46  ;;  %v1883_v53 = vunpack.i.l.bf16 %v2863_v46 }
 0x273   :  { %v2866_v5 = vsel %vm345_vm14, %v1798_v39, %v1799_v14  ;;  %v1824_v46 = vunpack.i.h.bf16 %v2784_v13 }
 0x274   :  { %v2015_v47 = vpack.i.bf16 %v1799_v14, %v2866_v5  ;;  %v1015_v34 = vsel %vm406_vm1, %v1863_v19, %v1864_v52 }
 0x275   :  { %1072 = vmatpush.msrb.mxu2 %v1015_v34 }
 0x276   :  { %2026 = vrot.lane.b32.xlu1 %v3131_v51, %s2085_s18  ;;  %2016 = vrot.lane.b32.xlu0 %v2015_v47, %s2084_s1  ;;  %v958_v47 = vsel %vm345_vm14, %v1838_v16, %v1839_v31 }
 0x278   :  { %v2873_v9 = vpop.permute.xlu1 %1811 }
 0x279   :  { %v1877_v44 = vpop.permute.xlu2 %1876  ;;  %v2875_v62 = vpop.permute.xlu0 %1896  ;;  %v1813_v32 = vunpack.i.l.bf16 %v2873_v9 }
 0x27a   :  { %v1879_v41 = vunpack.i.h.bf16 %v1877_v44  ;;  %v1878_v29 = vunpack.i.l.bf16 %v1877_v44 }
 0x27c   :  { %v963_v0 = vsel %vm345_vm14, %v1878_v29, %v1879_v41  ;;  %v1823_v41 = vunpack.i.l.bf16 %v2784_v13  ;;  %v957_v29 = vsel %vm345_vm14, %v1833_v61, %v1834_v3  ;;  %v1814_v13 = vunpack.i.h.bf16 %v2873_v9 }
 0x27d   :  { %1044 = vmatpush.msrb.mxu1 %v963_v0  ;;  %v1013_v0 = vsel %vm406_vm1, %v1883_v53, %v1884_v36  ;;  %v1753_v53 = vunpack.i.l.bf16 %v2780_v25 }
 0x27e   :  { %2021 = vrot.lane.b32.xlu0 %v2415_v17, %s2084_s1  ;;  %v955_v55 = vsel %vm345_vm14, %v1823_v41, %v1824_v46  ;;  %v953_v9 = vsel %vm345_vm14, %v1813_v32, %v1814_v13  ;;  %v1788_v46 = vunpack.i.l.bf16 %v2853_v8  ;;  %v1784_v41 = vunpack.i.h.bf16 %v2743_v57 }
 0x27f   :  { %v1769_v13 = vunpack.i.h.bf16 %v2731_v35  ;;  %v1768_v32 = vunpack.i.l.bf16 %v2731_v35 }
 0x280   :  { %v1827_v21 = vpop.permute.xlu1 %1826 }
 0x281   :  { %v1892_v24 = vpop.permute.xlu2 %1891  ;;  %v2880_v12 = vpop.permute.xlu0 %1911  ;;  %v1829_v19 = vunpack.i.h.bf16 %v1827_v21  ;;  %v671_v35 = vsel %vm278_vm12, %v1768_v32, %v1769_v13 }
 0x282   :  { %v1894_v34 = vunpack.i.h.bf16 %v1892_v24  ;;  %v1893_v18 = vunpack.i.l.bf16 %v1892_v24  ;;  %v1913_v3 = vunpack.i.l.bf16 %v2880_v12 }
 0x284   :  { %v1012_v24 = vsel %vm406_vm1, %v1893_v18, %v1894_v34  ;;  %v1794_v18 = vunpack.i.h.bf16 %v2754_v30 }
 0x286   :  { %2036 = vrot.lane.b32.xlu0 %v3131_v51, %s2084_s1  ;;  %v1828_v51 = vunpack.i.l.bf16 %v1827_v21 }
 0x288   :  { %v1842_v58 = vpop.permute.xlu1 %1841  ;;  %v956_v21 = vsel %vm345_vm14, %v1828_v51, %v1829_v19 }
 0x289   :  { %v2884_v49 = vpop.permute.xlu2 %1906  ;;  %v2886_v59 = vpop.permute.xlu0 %1921  ;;  %v1844_v48 = vunpack.i.h.bf16 %v1842_v58  ;;  %v1843_v28 = vunpack.i.l.bf16 %v1842_v58  ;;  %v1819_v58 = vunpack.i.h.bf16 %v2813_v11 }
 0x28b   :  { %v959_v15 = vsel %vm345_vm14, %v1843_v28, %v1844_v48  ;;  %v1808_v48 = vunpack.i.l.bf16 %v2756_v6 }
 0x290   :  { %v1857_v37 = vpop.permute.xlu1 %1856 }
 0x291   :  { %v2890_v42 = vpop.permute.xlu2 %1931  ;;  %v1859_v17 = vunpack.i.h.bf16 %v1857_v37  ;;  %v1858_v7 = vunpack.i.l.bf16 %v1857_v37  ;;  %v2892_v43 = vpop.permute.xlu0 %1936  ;;  %v1818_v37 = vunpack.i.l.bf16 %v2813_v11  ;;  %v1809_v11 = vunpack.i.h.bf16 %v2756_v6 }
 0x293   :  { %v962_v2 = vsel %vm345_vm14, %v1858_v7, %v1859_v17  ;;  %v954_v28 = vsel %vm345_vm14, %v1818_v37, %v1819_v58  ;;  %v952_v31 = vsel %vm345_vm14, %v1808_v48, %v1809_v11  ;;  %v1773_v37 = vunpack.i.l.bf16 %v2833_v26 }
 0x294   :  { %1045 = vmatpush.msrb.mxu1 %v962_v2 }
 0x296   :  { %1046 = vmatpush.msrb.mxu1 %v961_v54 }
 0x298   :  { %v1872_v20 = vpop.permute.xlu1 %1871  ;;  %1047 = vmatpush.msrb.mxu1 %v960_v1  ;;  %v1914_v1 = vunpack.i.h.bf16 %v2880_v12  ;;  %v1793_v12 = vunpack.i.l.bf16 %v2754_v30 }
 0x299   :  { %v2903_v27 = vpop.permute.xlu2 %1946  ;;  %v1874_v14 = vunpack.i.h.bf16 %v1872_v20  ;;  %v1873_v39 = vunpack.i.l.bf16 %v1872_v20  ;;  %v2905_v52 = vpop.permute.xlu0 %1976  ;;  %v1754_v20 = vunpack.i.h.bf16 %v2780_v25 }
 0x29a   :  { %1048 = vmatpush.msrb.mxu1 %v959_v15  ;;  %v3132_v15 = vld [vmem:[#allocation18_spill] sm:$0xff]  ;;  %v1010_v25 = vsel %vm406_vm1, %v1913_v3, %v1914_v1  ;;  %v3134_v1 = vld [vmem:[#allocation8_spill] sm:$0xff] }
 0x29b   :  { %v1014_v44 = vsel %vm406_vm1, %v1873_v39, %v1874_v14  ;;  %v1569_v19 = vunpack.i.h.bf16 %v3132_v15  ;;  %v572_v30 = vsel %vm243_vm2, %v1753_v53, %v1754_v20  ;;  %v1899_v20 = vunpack.i.h.bf16 %v2875_v62 }
 0x29c   :  { %1049 = vmatpush.msrb.mxu1 %v958_v47  ;;  %1073 = vmatpush.msrb.mxu2 %v1014_v44  ;;  %v1568_v47 = vunpack.i.l.bf16 %v3132_v15  ;;  %v1789_v44 = vunpack.i.h.bf16 %v2853_v8  ;;  %v1898_v53 = vunpack.i.l.bf16 %v2875_v62  ;;  %v1909_v15 = vunpack.i.h.bf16 %v2884_v49 }
 0x29e   :  { %1050 = vmatpush.msrb.mxu1 %v957_v29  ;;  %1074 = vmatpush.msrb.mxu2 %v1013_v0  ;;  %v1783_v29 = vunpack.i.l.bf16 %v2743_v57  ;;  %v676_v0 = vsel %vm278_vm12, %v1793_v12, %v1794_v18  ;;  %v675_v58 = vsel %vm278_vm12, %v1788_v46, %v1789_v44  ;;  %v1774_v57 = vunpack.i.h.bf16 %v2833_v26 }
 0x29f   :  { %v1168_v18 = vsel %vm243_vm2, %v1898_v53, %v1899_v20  ;;  %v1924_v12 = vunpack.i.h.bf16 %v2886_v59 }
 0x2a0   :  { %v2918_v4 = vpop.permute.xlu1 %1886  ;;  %1051 = vmatpush.msrb.mxu1 %v956_v21  ;;  %1075 = vmatpush.msrb.mxu2 %v1012_v24  ;;  %v674_v21 = vsel %vm278_vm12, %v1783_v29, %v1784_v41  ;;  %v442_v24 = vpop.f32.mrf.mxu2  ;;  %v672_v26 = vsel %vm278_vm12, %v1773_v37, %v1774_v57 }
 0x2a1   :  { %v2922_v17 = vpop.permute.xlu2 %1956  ;;  %v1992_v7 = vpop.permute.xlu0 %1991 }
 0x2a2   :  { %v1994_v38 = vunpack.i.h.bf16 %v1992_v7  ;;  %v1993_v2 = vunpack.i.l.bf16 %v1992_v7  ;;  %1052 = vmatpush.msrb.mxu1 %v955_v55 }
 0x2a4   :  { %v574_v54 = vsel %vm243_vm2, %v1993_v2, %v1994_v38  ;;  %1053 = vmatpush.msrb.mxu1 %v954_v28  ;;  %v1764_v38 = vunpack.i.h.bf16 %v2729_v60  ;;  %v1763_v2 = vunpack.i.l.bf16 %v2729_v60  ;;  %v1759_v28 = vunpack.i.h.bf16 %v2807_v56 }
 0x2a5   :  { %630 = vmatpush.msra.mxu0 %v574_v54  ;;  %v1758_v54 = vunpack.i.l.bf16 %v2807_v56  ;;  %v1889_v60 = vunpack.i.h.bf16 %v2918_v4  ;;  %v2988_v56 = vld [vmem:[%s3095_s4] sm:$0xff]  ;;  %s2090_s4 = smov [#allocation4]  }
 0x2a6   :  { %1054 = vmatpush.msrb.mxu1 %v953_v9  ;;  %v3133_v9 = vld [vmem:[#allocation10_spill] sm:$0xff]  ;;  %s1343_s9 = sshll.u32 %s2090_s4, 4  ;;  %s1344_s9 = int_to_ptr.vmem [resolvable:$true] %s1343_s9 }
 0x2a8   :  { %v1902_v16 = vpop.permute.xlu1 %1901  ;;  %1055 = vmatpush.msrb.mxu1 %v952_v31 }
 0x2a9   :  { %v1904_v61 = vunpack.i.h.bf16 %v1902_v16  ;;  %v1903_v36 = vunpack.i.l.bf16 %v1902_v16  ;;  %v1967_v6 = vpop.permute.xlu2 %1966  ;;  %v670_v16 = vsel %vm278_vm12, %v1763_v2, %v1764_v38 }
 0x2aa   :  { %v1969_v14 = vunpack.i.h.bf16 %v1967_v6  ;;  %v1968_v39 = vunpack.i.l.bf16 %v1967_v6  ;;  %1056 = vmatpush.msrb.mxu1 %v2792_v10  ;;  %v2947_v10 = vld [vmem:[%s3094_s3 + $0x8] sm:$0xff] }
 0x2ab   :  { %v1011_v34 = vsel %vm406_vm1, %v1903_v36, %v1904_v61  ;;  %v1888_v61 = vunpack.i.l.bf16 %v2918_v4  ;;  %v669_v36 = vsel %vm278_vm12, %v1758_v54, %v1759_v28  ;;  %v3135_v4 = vld [vmem:[#allocation17_spill] sm:$0xff]  ;;  %v3136_v28 = vld [vmem:[#allocation14_spill] sm:$0xff] }
 0x2ac   :  { %v573_v51 = vsel %vm243_vm2, %v1968_v39, %v1969_v14  ;;  %1057 = vmatpush.msrb.mxu1 %v2866_v5  ;;  %1076 = vmatpush.msrb.mxu2 %v1011_v34  ;;  %v1009_v5 = vsel %vm406_vm1, %v1568_v47, %v1569_v19  ;;  %v2994_v39 = vpop.permute.xlu0 %1996  ;;  %v1908_v19 = vunpack.i.l.bf16 %v2884_v49 }
 0x2ad   :  { %631 = vmatpush.msra.mxu0 %v573_v51  ;;  %v482_v55 = vpop.f32.mrf.mxu0  ;;  %v1169_v47 = vsel %vm243_vm2, %v1888_v61, %v1889_v60  ;;  %v1923_v51 = vunpack.i.l.bf16 %v2886_v59 }
 0x2ae   :  { %1058 = vmatpush.msrb.mxu1 %v2645_v23  ;;  %1077 = vmatpush.msrb.mxu2 %v1010_v25  ;;  %v1779_v23 = vunpack.i.h.bf16 %v2741_v45  ;;  %v1167_v49 = vsel %vm243_vm2, %v1908_v19, %v1909_v15  ;;  %v1978_v15 = vunpack.i.l.bf16 %v2905_v52 }
 0x2af   :  { %632 = vmatpush.msra.mxu0 %v572_v30  ;;  %1059 = vmatmul.f32.vlgmr.msrb.gmra.mxu1 %v2710_v50  ;;  %v1778_v50 = vunpack.i.l.bf16 %v2741_v45  ;;  %v1165_v29 = vsel %vm243_vm2, %v1923_v51, %v1924_v12 }
 0x2b0   :  { %1363 = vmatmul.msk.f32.vlgmr.msra.gmra.mxu0 %vm593_vm0, %v2947_v10  ;;  %v2960_v8 = vpop.permute.xlu1 %1916  ;;  %1078 = vmatpush.msrb.mxu2 %v1009_v5 }
 0x2b1   :  { %696 = vmatpush.msrb.mxu0 %v676_v0  ;;  %1367 = vmatmul.msk.f32.vlgmr.msrb.gmra.mxu2 %vm421_vm13, %v2695_v22  ;;  %v673_v7 = vsel %vm278_vm12, %v1778_v50, %v1779_v23  ;;  %v1919_v34 = vunpack.i.h.bf16 %v2960_v8  ;;  %v1918_v62 = vunpack.i.l.bf16 %v2960_v8  ;;  %v1939_v0 = vunpack.i.h.bf16 %v2892_v43 }
 0x2b2   :  { %v1972_v25 = vpop.permute.xlu2 %1971  ;;  %v1938_v8 = vunpack.i.l.bf16 %v2892_v43  ;;  %v1949_v50 = vunpack.i.h.bf16 %v2903_v27 }
 0x2b3   :  { %697 = vmatpush.msrb.mxu0 %v675_v58  ;;  %v1166_v30 = vsel %vm243_vm2, %v1918_v62, %v1919_v34  ;;  %v1948_v58 = vunpack.i.l.bf16 %v2903_v27  ;;  %v1974_v32 = vunpack.i.h.bf16 %v1972_v25  ;;  %v1934_v34 = vunpack.i.h.bf16 %v2890_v42 }
 0x2b4   :  { %v1163_v13 = vsel %vm243_vm2, %v1938_v8, %v1939_v0  ;;  %v1933_v62 = vunpack.i.l.bf16 %v2890_v42 }
 0x2b5   :  { %698 = vmatpush.msrb.mxu0 %v674_v21  ;;  %v1959_v21 = vunpack.i.h.bf16 %v2922_v17 }
 0x2b6   :  { %v462_v22 = vpop.f32.mrf.mxu3  ;;  %v1270_v42 = vsel %vm278_vm12, %v1933_v62, %v1934_v34 }
 0x2b7   :  { %v463_v45 = vadd.f32 %v462_v22, %v442_v24  ;;  %699 = vmatpush.msrb.mxu0 %v673_v7  ;;  %v1958_v24 = vunpack.i.l.bf16 %v2922_v17  ;;  %v1973_v22 = vunpack.i.l.bf16 %v1972_v25  ;;  %v1162_v7 = vsel %vm243_vm2, %v1948_v58, %v1949_v50 }
 0x2b8   :  { %v1927_v11 = vpop.permute.xlu1 %1926 }
 0x2b9   :  { %v483_v48 = vadd.f32 %v482_v55, %v463_v45  ;;  %700 = vmatpush.msrb.mxu0 %v672_v26  ;;  %v1929_v44 = vunpack.i.h.bf16 %v1927_v11  ;;  %v1928_v46 = vunpack.i.l.bf16 %v1927_v11  ;;  %v1161_v38 = vsel %vm243_vm2, %v1958_v24, %v1959_v21 }
 0x2ba   :  { %v1987_v43 = vpop.permute.xlu2 %1986  ;;  %v1160_v2 = vsel %vm243_vm2, %v1973_v22, %v1974_v32 }
 0x2bb   :  { %v755_v31 = vmul.f32 %v3133_v9, %v483_v48  ;;  %701 = vmatpush.msrb.mxu0 %v671_v35  ;;  %v1164_v57 = vsel %vm243_vm2, %v1928_v46, %v1929_v44  ;;  %v1989_v27 = vunpack.i.h.bf16 %v1987_v43  ;;  %v1988_v45 = vunpack.i.l.bf16 %v1987_v43 }
 0x2bc   :  { %v1998_v43 = vunpack.i.l.bf16 %v2994_v39 }
 0x2bd   :  { %v779_v3 = vadd.f32 %v3134_v1, %v755_v31  ;;  %702 = vmatpush.msrb.mxu0 %v670_v16  ;;  %v1159_v26 = vsel %vm243_vm2, %v1988_v45, %v1989_v27  ;;  %v3137_v31 = vld [vmem:[#allocation9_spill] sm:$0xff] }
 0x2bf   :  { %v783_v6 = vmax.f32 %v779_v3, 0.0  ;;  %703 = vmatpush.msrb.mxu0 %v669_v36 }
 0x2c0   :  { %v2992_v14 = vpop.permute.xlu1 %1941 }
 0x2c1   :  { %787 = vst [vmem:[#allocation4] sm:$0xff] %v783_v6  ;;  %704 = vmatpush.msrb.mxu0 %v3135_v4  ;;  %v1979_v4 = vunpack.i.h.bf16 %v2905_v52  ;;  %v1944_v12 = vunpack.i.h.bf16 %v2992_v14  ;;  %v1943_v51 = vunpack.i.l.bf16 %v2992_v14 }
 0x2c2   :  { %1364 = vmatmul.msk.f32.vlgmr.msrb.gmra.mxu0 %vm685_vm15, %v2988_v56  ;;  %v3034_v6 = vpop.permute.xlu2 %2006 }
 0x2c3   :  { %1191 = vmatpush.msra.mxu0 %v1169_v47  ;;  %v1269_v8 = vsel %vm278_vm12, %v1943_v51, %v1944_v12 }
 0x2c5   :  { %1192 = vmatpush.msra.mxu0 %v1168_v18 }
 0x2c7   :  { %1193 = vmatpush.msra.mxu0 %v1167_v49  ;;  %v1170_v49 = vsel %vm243_vm2, %v1978_v15, %v1979_v4 }
 0x2c8   :  { %v3009_v5 = vpop.permute.xlu1 %1951 }
 0x2c9   :  { %1194 = vmatpush.msra.mxu0 %v1166_v30  ;;  %v2012_v41 = vpop.permute.xlu0 %2011  ;;  %v1954_v44 = vunpack.i.h.bf16 %v3009_v5  ;;  %v1953_v52 = vunpack.i.l.bf16 %v3009_v5 }
 0x2ca   :  { %v2014_v59 = vunpack.i.h.bf16 %v2012_v41  ;;  %v2013_v23 = vunpack.i.l.bf16 %v2012_v41  ;;  %v2032_v46 = vpop.permute.xlu2 %2031 }
 0x2cb   :  { %1195 = vmatpush.msra.mxu0 %v1165_v29  ;;  %v2034_v5 = vunpack.i.h.bf16 %v2032_v46  ;;  %v1268_v21 = vsel %vm278_vm12, %v1953_v52, %v1954_v44 }
 0x2cc   :  { %v1172_v37 = vsel %vm243_vm2, %v2013_v23, %v2014_v59  ;;  %v2033_v59 = vunpack.i.l.bf16 %v2032_v46 }
 0x2cd   :  { %1196 = vmatpush.msra.mxu0 %v1164_v57  ;;  %1224 = vmatpush.msra.mxu2 %v1172_v37 }
 0x2ce   :  { %v1156_v22 = vsel %vm243_vm2, %v2033_v59, %v2034_v5 }
 0x2cf   :  { %1197 = vmatpush.msra.mxu0 %v1163_v13  ;;  %v1999_v13 = vunpack.i.h.bf16 %v2994_v39 }
 0x2d0   :  { %v3022_v55 = vpop.permute.xlu1 %1961 }
 0x2d1   :  { %1198 = vmatpush.msra.mxu0 %v1162_v7  ;;  %v1964_v41 = vunpack.i.h.bf16 %v3022_v55  ;;  %v1963_v29 = vunpack.i.l.bf16 %v3022_v55  ;;  %v2009_v7 = vunpack.i.h.bf16 %v3034_v6  ;;  %v2008_v55 = vunpack.i.l.bf16 %v3034_v6 }
 0x2d2   :  { %v1265_v39 = vsel %vm278_vm12, %v1998_v43, %v1999_v13 }
 0x2d3   :  { %1199 = vmatpush.msra.mxu0 %v1161_v38 }
 0x2d5   :  { %1200 = vmatpush.msra.mxu0 %v1160_v2 }
 0x2d6   :  { %v3026_v17 = vpop.f32.mrf.mxu3 }
 0x2d7   :  { %1201 = vmatpush.msra.mxu0 %v1159_v26 }
 0x2d8   :  { %v3029_v11 = vpop.permute.xlu1 %1981 }
 0x2d9   :  { %v1984_v58 = vunpack.i.h.bf16 %v3029_v11  ;;  %v1983_v57 = vunpack.i.l.bf16 %v3029_v11 }
 0x2db   :  { %v1266_v27 = vsel %vm278_vm12, %v1983_v57, %v1984_v58 }
 0x2de   :  { %v1319_v48 = vpop.f32.mrf.mxu3 }
 0x2df   :  { %v1325_v54 = vmul.f32 %v1319_v48, %v3136_v28  ;;  %v1264_v48 = vsel %vm278_vm12, %v2008_v55, %v2009_v7 }
 0x2e0   :  { %v2002_v35 = vpop.permute.xlu1 %2001 }
 0x2e1   :  { %v1329_v16 = vadd.f32 %v1325_v54, %v3137_v31  ;;  %v2004_v3 = vunpack.i.h.bf16 %v2002_v35  ;;  %v2003_v60 = vunpack.i.l.bf16 %v2002_v35 }
 0x2e3   :  { %v1333_v61 = vmax.f32 %v1329_v16, 0.0  ;;  %v1158_v36 = vsel %vm243_vm2, %v2003_v60, %v2004_v3  ;;  %v3138_v3 = vld [vmem:[#allocation13_spill] sm:$0xff] }
 0x2e4   :  { %1202 = vmatpush.msra.mxu0 %v1158_v36  ;;  %v3139_v36 = vld [vmem:[#allocation11_spill] sm:$0xff] }
 0x2e5   :  { %1338 = vst [vmem:[#allocation4 + $0x38] sm:$0xff] %v1333_v61  ;;  %v3036_v20 = vpop.f32.mrf.mxu1 }
 0x2e8   :  { %v2017_v53 = vpop.permute.xlu0 %2016  ;;  %v2027_v32 = vpop.permute.xlu1 %2026 }
 0x2e9   :  { %v2019_v19 = vunpack.i.h.bf16 %v2017_v53  ;;  %v2018_v47 = vunpack.i.l.bf16 %v2017_v53  ;;  %v2029_v45 = vunpack.i.h.bf16 %v2027_v32  ;;  %v2028_v38 = vunpack.i.l.bf16 %v2027_v32 }
 0x2eb   :  { %v1171_v18 = vsel %vm243_vm2, %v2018_v47, %v2019_v19  ;;  %v1263_v54 = vsel %vm278_vm12, %v2028_v38, %v2029_v45  ;;  %v3140_v19 = vld [vmem:[#allocation7_spill] sm:$0xff] }
 0x2ec   :  { %1225 = vmatpush.msra.mxu2 %v1171_v18  ;;  %v3141_v47 = vld [vmem:[#allocation15_spill] sm:$0xff] }
 0x2ed   :  { %v732_v25 = vpop.f32.mrf.mxu1 }
 0x2ee   :  { %v758_v30 = vmul.f32 %v3136_v28, %v732_v25  ;;  %1226 = vmatpush.msra.mxu2 %v1170_v49 }
 0x2ef   :  { %1368 = vmatmul.msk.f32.vlgmr.msra.gmra.mxu2 %vm593_vm0, %v2947_v10  ;;  %v1267_v10 = vsel %vm278_vm12, %v1963_v29, %v1964_v41 }
 0x2f0   :  { %1286 = vmatpush.msrb.mxu2 %v1270_v42  ;;  %v782_v14 = vadd.f32 %v3137_v31, %v758_v30  ;;  %v2022_v0 = vpop.permute.xlu0 %2021 }
 0x2f1   :  { %v2024_v23 = vunpack.i.h.bf16 %v2022_v0  ;;  %v2023_v50 = vunpack.i.l.bf16 %v2022_v0 }
 0x2f2   :  { %1287 = vmatpush.msrb.mxu2 %v1269_v8  ;;  %v786_v37 = vmax.f32 %v782_v14, 0.0 }
 0x2f3   :  { %v1157_v24 = vsel %vm243_vm2, %v2023_v50, %v2024_v23 }
 0x2f4   :  { %1288 = vmatpush.msrb.mxu2 %v1268_v21  ;;  %790 = vst [vmem:[#allocation4 + $0x18] sm:$0xff] %v786_v37  ;;  %1203 = vmatpush.msra.mxu0 %v1157_v24 }
 0x2f6   :  { %1289 = vmatpush.msrb.mxu2 %v1267_v10  ;;  %1204 = vmatpush.msra.mxu0 %v1156_v22 }
 0x2f8   :  { %1290 = vmatpush.msrb.mxu2 %v1266_v27  ;;  %v2037_v2 = vpop.permute.xlu0 %2036 }
 0x2f9   :  { %v2039_v26 = vunpack.i.h.bf16 %v2037_v2  ;;  %v2038_v11 = vunpack.i.l.bf16 %v2037_v2 }
 0x2fa   :  { %1291 = vmatpush.msrb.mxu2 %v1265_v39 }
 0x2fb   :  { %v1155_v28 = vsel %vm243_vm2, %v2038_v11, %v2039_v26 }
 0x2fc   :  { %1292 = vmatpush.msrb.mxu2 %v1264_v48  ;;  %1205 = vmatpush.msra.mxu0 %v1155_v28 }
 0x2fe   :  { %1293 = vmatpush.msrb.mxu2 %v1263_v54  ;;  %1206 = vmatpush.msra.mxu0 %v2581_v63 }
 0x2ff   :  { %1207 = vmatmul.f32.vlgmr.msra.gmra.mxu0 %v2845_v33 }
 0x300   :  { %1294 = vmatpush.msrb.mxu2 %v2490_v40 }
 0x301   :  { %1369 = vmatmul.msk.f32.vlgmr.msrb.gmra.mxu2 %vm685_vm15, %v2988_v56 }
 0x32c   :  { %v1060_v16 = vpop.f32.mrf.mxu1 }
 0x32d   :  { %v634_v35 = vpop.f32.mrf.mxu0  ;;  %v1061_v61 = vadd.f32 %v1060_v16, %v3026_v17 }
 0x32e   :  { %v635_v31 = vadd.f32 %v634_v35, %v3036_v20 }
 0x330   :  { %v756_v60 = vmul.f32 %v3138_v3, %v635_v31 }
 0x332   :  { %v780_v6 = vadd.f32 %v3139_v36, %v756_v60 }
 0x334   :  { %v784_v53 = vmax.f32 %v780_v6, 0.0  ;;  %v1080_v4 = vpop.f32.mrf.mxu2 }
 0x335   :  { %v1081_v63 = vadd.f32 %v1080_v4, %v1061_v61 }
 0x336   :  { %788 = vst [vmem:[#allocation4 + $0x8] sm:$0xff] %v784_v53 }
 0x337   :  { %v1322_v33 = vmul.f32 %v1081_v63, %v3133_v9 }
 0x339   :  { %v1326_v40 = vadd.f32 %v1322_v33, %v3134_v1 }
 0x33b   :  { %v1330_v15 = vmax.f32 %v1326_v40, 0.0 }
 0x33d   :  { %1335 = vst [vmem:[#allocation4 + $0x20] sm:$0xff] %v1330_v15 }
 0x33f   :  { %v706_v56 = vpop.f32.mrf.mxu0 }
 0x340   :  { %v757_v20 = vmul.f32 %v3140_v19, %v706_v56 }
 0x342   :  { %v781_v34 = vadd.f32 %v3141_v47, %v757_v20 }
 0x344   :  { %v785_v62 = vmax.f32 %v781_v34, 0.0 }
 0x346   :  { %789 = vst [vmem:[#allocation4 + $0x10] sm:$0xff] %v785_v62 }
 0x372   :  { %v1228_v17 = vpop.f32.mrf.mxu2 }
 0x37c   :  { %v1208_v18 = vpop.f32.mrf.mxu0 }
 0x37d   :  { %v1229_v12 = vadd.f32 %v1228_v17, %v1208_v18 }
 0x37f   :  { %v1323_v51 = vmul.f32 %v1229_v12, %v3138_v3 }
 0x381   :  { %v1327_v25 = vadd.f32 %v1323_v51, %v3139_v36 }
 0x383   :  { %v1331_v49 = vmax.f32 %v1327_v25, 0.0 }
 0x384   :  { %v1296_v9 = vpop.f32.mrf.mxu2 }
 0x385   :  { %v1324_v1 = vmul.f32 %v1296_v9, %v3140_v19  ;;  %1336 = vst [vmem:[#allocation4 + $0x28] sm:$0xff] %v1331_v49 }
 0x387   :  { %v1328_v44 = vadd.f32 %v1324_v1, %v3141_v47 }
 0x389   :  { %v1332_v52 = vmax.f32 %v1328_v44, 0.0 }
 0x38b   :  { %1337 = vst [vmem:[#allocation4 + $0x30] sm:$0xff] %v1332_v52 }
 0x38c   :  { %1351 = dma.vmem_to_hbm [thread:$0]  %s1344_s9, 1024, %s1346_s12, [#allocation5], %s2091_s13, %s2091_s13, %s2092_s14  }
 0x38d   :  { %2066 = dma.done.wait [#allocation5], 1024  }
 0x38e   :  { %2067 = vsyncadd [#allocation5], 4294966272 }
 0x38f   :  { %1356 = vsyncpa [#allocation5], 1 }

</bundles_post_ra>
